<compile_context>
chip_gen: v6e
topology: v6e:2x2x1
jax: 0.10.0
libtpu: 0.0.40
codegen_flags: <defaults>
</compile_context>

<pallas_src>
import functools
import math

import jax
import jax.numpy as jnp
from jax.experimental import pallas as pl
from jax.experimental.pallas import tpu as pltpu


_SUBLANE_ALIGN = {4: 8, 2: 16, 1: 32}   # dtype itemsize -> min sublane multiple


def _sublane_align(dtype):
    return _SUBLANE_ALIGN.get(jnp.dtype(dtype).itemsize, 8)


@functools.lru_cache(maxsize=None)
def _vmem_capacity_bytes():
    try:
        cap = getattr(pltpu.get_tpu_info(), "vmem_capacity_bytes", None)
        if cap:
            return int(cap)
    except Exception:
        pass
    return 64 * 1024 * 1024            # conservative default (v7x per-TC VMEM)


def _vmem_limit_bytes():
    # Half the physical VMEM, never more than 64 MiB:
    #   v5e/v6e (128 MiB physical) -> 64 MiB;  v7x (64 MiB physical) -> 32 MiB.
    return min(_vmem_capacity_bytes() // 2, 64 * 1024 * 1024)


def _target_block_bytes():
    # One block; double-buffered in+out is ~4x this, keep well under the limit.
    return max(1 << 20, min(4 << 20, _vmem_limit_bytes() // 8))


def _pick_tile(dim, align, cap):
    """Legal block size for one dim: full dim if it fits `cap`, else the
    largest `align` multiple <= cap (boundary blocks are clipped by Pallas)."""
    if dim <= cap:
        return dim
    return max((cap // align) * align, align)


def _cost_estimate(x):
    itemsize = jnp.dtype(x.dtype).itemsize
    return pl.CostEstimate(flops=0, transcendentals=0,
                           bytes_accessed=2 * x.size * itemsize)


def _is_concrete(x):
    try:
        return not isinstance(x, jax.core.Tracer)
    except Exception:
        return False


# ---------------------------------------------------------------------------
# Case 1: NCHW -> NHWC (dims == (0, 2, 3, 1)).
# ---------------------------------------------------------------------------
def _nchw_to_nhwc_lane_dense_kernel(x_ref, o_ref):
    # x_ref: (C, Hb, Wb) -> o_ref: (Hb, Wb*C)   (batch dim squeezed out)
    t = jnp.transpose(x_ref[...], (1, 2, 0))      # (Hb, Wb, C)
    o_ref[...] = t.reshape(o_ref.shape)           # lane-dense (Hb, Wb*C) slab


def _nchw_to_nhwc_lane_dense(x):
    N, C, H, W = x.shape
    itemsize = jnp.dtype(x.dtype).itemsize
    sub = _sublane_align(x.dtype)
    target_elems = max(1, _target_block_bytes() // itemsize)

    Wb = _pick_tile(W, 128, max(128, min(1024, target_elems // max(C * sub, 1))))
    hb_cap = max(sub, target_elems // max(C * Wb, 1))
    Hb = _pick_tile(H, sub, hb_cap)

    grid = (N, pl.cdiv(H, Hb), pl.cdiv(W, Wb))
    out_flat = pl.pallas_call(
        _nchw_to_nhwc_lane_dense_kernel,
        out_shape=jax.ShapeDtypeStruct((N, H, W * C), x.dtype),
        grid=grid,
        in_specs=[pl.BlockSpec((pl.Squeezed(), C, Hb, Wb),
                               lambda n, hi, wi: (n, 0, hi, wi))],
        out_specs=pl.BlockSpec((pl.Squeezed(), Hb, Wb * C),
                               lambda n, hi, wi: (n, hi, wi)),
        compiler_params=pltpu.CompilerParams(
            dimension_semantics=("parallel",) * len(grid),
            vmem_limit_bytes=_vmem_limit_bytes()),
        cost_estimate=_cost_estimate(x),
    )(x)
    return out_flat.reshape(N, H, W, C)           # free trailing-dim split


def _nchw_to_nhwc_blocked_kernel(x_ref, o_ref):
    # x_ref: (Cb, Hb, Wb) -> o_ref: (Hb, Wb, Cb)
    o_ref[...] = jnp.transpose(x_ref[...], (1, 2, 0))


def _nchw_to_nhwc_blocked(x):
    N, C, H, W = x.shape
    itemsize = jnp.dtype(x.dtype).itemsize
    sub = _sublane_align(x.dtype)
    target_elems = max(1, _target_block_bytes() // itemsize)

    Wb = _pick_tile(W, 128, 512)
    if C < 128:
        Cb = C
    else:
        Cb = _pick_tile(C, 128, max(128, target_elems // max(sub * Wb, 1)))
    hb_cap = max(sub, target_elems // max(Cb * Wb, 1))
    Hb = _pick_tile(H, sub, hb_cap)

    grid = (N, pl.cdiv(C, Cb), pl.cdiv(H, Hb), pl.cdiv(W, Wb))
    return pl.pallas_call(
        _nchw_to_nhwc_blocked_kernel,
        out_shape=jax.ShapeDtypeStruct((N, H, W, C), x.dtype),
        grid=grid,
        in_specs=[pl.BlockSpec((pl.Squeezed(), Cb, Hb, Wb),
                               lambda n, ci, hi, wi: (n, ci, hi, wi))],
        out_specs=pl.BlockSpec((pl.Squeezed(), Hb, Wb, Cb),
                               lambda n, ci, hi, wi: (n, hi, wi, ci)),
        compiler_params=pltpu.CompilerParams(
            dimension_semantics=("parallel",) * len(grid),
            vmem_limit_bytes=_vmem_limit_bytes()),
        cost_estimate=_cost_estimate(x),
    )(x)


def _permute_nchw_to_nhwc(x):
    N, C, H, W = x.shape
    if C < 128 and _is_concrete(x):
        # Lane-dense output path.  The in-kernel (Hb, Wb, C) -> (Hb, Wb*C)
        # reshape is the only op here whose Mosaic lowering is not guaranteed
        # on every generation, so probe it (eager call) and fall back cleanly.
        # TODO(synk): drop the guard and enable this under jit once the
        # minor-dim shape_cast is confirmed on all target generations.
        try:
            return _nchw_to_nhwc_lane_dense(x)
        except Exception:
            pass
    return _nchw_to_nhwc_blocked(x)


# ---------------------------------------------------------------------------
# Case 2: permutation keeps the last axis (and possibly more) in place —
# pure DMA re-layout: merge the unmoved trailing run, block the innermost
# output leading axis, identity-copy body.
# ---------------------------------------------------------------------------
def _copy_kernel(x_ref, o_ref):
    o_ref[...] = x_ref[...]


def _make_leading_axes_permute(dims, k):
    # dims[j] == j for all j >= k; dims[:k] is a permutation of range(k); k >= 2.
    inv = tuple(dims.index(i) for i in range(k))    # output position feeding input axis i
    d = dims[k - 1]                                 # input axis -> innermost output leading axis

    def permute(x):
        shape = x.shape
        itemsize = jnp.dtype(x.dtype).itemsize
        sub = _sublane_align(x.dtype)
        lead_in = tuple(shape[:k])
        lead_out = tuple(shape[dims[j]] for j in range(k))
        M = math.prod(shape[k:])

        # Split the merged trailing run into (M1, M2): lane-aligned M2 when
        # possible, sublane-tileable M1.  All reshapes here are free.
        if M % 128 == 0:
            M2 = 128
            while M2 * 2 <= 512 and M % (M2 * 2) == 0:
                M2 *= 2
        else:
            M2 = M
        M1 = M // M2
        x2 = x.reshape(lead_in + (M1, M2))

        target_elems = max(1, _target_block_bytes() // itemsize)
        rem = max(1, target_elems // M2)
        M1b = _pick_tile(M1, sub, max(sub, rem))
        rem = max(1, rem // M1b)
        A = _pick_tile(shape[d], 1, max(1, rem))    # innermost output leading block

        # Grid: element-wise over the other leading output axes, blocked over
        # output axis k-1 (extent A), then M1 tiles (M2 is one full-lane tile).
        grid = tuple(lead_out[j] for j in range(k - 1)) + (
            pl.cdiv(shape[d], A), pl.cdiv(M1, M1b))

        in_blk = tuple(A if i == d else pl.Squeezed() for i in range(k)) + (M1b, M2)
        out_blk = tuple(A if j == k - 1 else pl.Squeezed() for j in range(k)) + (M1b, M2)

        def in_index(*idx):
            return tuple(idx[inv[i]] for i in range(k)) + (idx[k], 0)

        def out_index(*idx):
            return tuple(idx[:k]) + (idx[k], 0)

        out2 = pl.pallas_call(
            _copy_kernel,
            out_shape=jax.ShapeDtypeStruct(lead_out + (M1, M2), x.dtype),
            grid=grid,
            in_specs=[pl.BlockSpec(in_blk, in_index)],
            out_specs=pl.BlockSpec(out_blk, out_index),
            compiler_params=pltpu.CompilerParams(
                dimension_semantics=("parallel",) * len(grid),
                vmem_limit_bytes=_vmem_limit_bytes()),
            cost_estimate=_cost_estimate(x),
        )(x2)
        return out2.reshape(lead_out + tuple(shape[k:]))

    return permute


# ---------------------------------------------------------------------------
# Case 3: generic fallback (the last axis moves and it is not NCHW->NHWC).
# ---------------------------------------------------------------------------
def _make_fallback_permute(dims):
    ndim = len(dims)

    def permute(x):
        shape = x.shape
        out_shape = tuple(shape[d] for d in dims)

        # Grid over a leading output axis whose source is also a leading input
        # axis (keeps both blocks' last-two dims full-extent and legal).
        grid_axis = None
        for j in range(max(ndim - 2, 0)):
            if dims[j] < ndim - 2:
                grid_axis = j
                break

        if grid_axis is None:
            # TODO(synk): tile general trailing-axes transposes; this path keeps
            # the whole array in VMEM and is only intended for small inputs.
            def kernel(x_ref, o_ref):
                o_ref[...] = jnp.transpose(x_ref[...], dims)

            return pl.pallas_call(
                kernel,
                out_shape=jax.ShapeDtypeStruct(out_shape, x.dtype),
                in_specs=[pl.BlockSpec(shape, lambda: (0,) * ndim)],
                out_specs=pl.BlockSpec(out_shape, lambda: (0,) * ndim),
                compiler_params=pltpu.CompilerParams(
                    vmem_limit_bytes=_vmem_limit_bytes()),
                cost_estimate=_cost_estimate(x),
            )(x)

        src = dims[grid_axis]
        perm_view = tuple(d - (1 if d > src else 0)
                          for j, d in enumerate(dims) if j != grid_axis)

        def kernel(x_ref, o_ref):
            o_ref[...] = jnp.transpose(x_ref[...], perm_view)

        in_blk = tuple(pl.Squeezed() if i == src else shape[i] for i in range(ndim))
        out_blk = tuple(pl.Squeezed() if j == grid_axis else out_shape[j]
                        for j in range(ndim))

        def in_index(g):
            return tuple(g if i == src else 0 for i in range(ndim))

        def out_index(g):
            return tuple(g if j == grid_axis else 0 for j in range(ndim))

        return pl.pallas_call(
            kernel,
            out_shape=jax.ShapeDtypeStruct(out_shape, x.dtype),
            grid=(shape[src],),
            in_specs=[pl.BlockSpec(in_blk, in_index)],
            out_specs=pl.BlockSpec(out_blk, out_index),
            compiler_params=pltpu.CompilerParams(
                dimension_semantics=("parallel",),
                vmem_limit_bytes=_vmem_limit_bytes()),
            cost_estimate=_cost_estimate(x),
        )(x)

    return permute


# ---------------------------------------------------------------------------
# Public factory mirroring torch's Permute(*dims).
# ---------------------------------------------------------------------------
def make_permute(*dims):
    if len(dims) == 1 and isinstance(dims[0], (tuple, list)):
        dims = tuple(dims[0])
    ndim = len(dims)
    dims = tuple(int(d) % ndim for d in dims)
    if sorted(dims) != list(range(ndim)):
        raise ValueError(f"{dims} is not a permutation of {tuple(range(ndim))}")

    if dims == tuple(range(ndim)):
        return lambda x: x                              # identity permutation
    if ndim == 4 and dims == (0, 2, 3, 1):
        return _permute_nchw_to_nhwc                    # channels-last transpose
    if dims[-1] == ndim - 1:
        k = ndim
        while k > 0 and dims[k - 1] == k - 1:
            k -= 1
        return _make_leading_axes_permute(dims, k)      # pure index_map re-layout
    return _make_fallback_permute(dims)


if __name__ == "__main__":
    key = jax.random.PRNGKey(0)
    x = jax.random.normal(key, (2, 4, 16, 16), dtype=jnp.float32)   # NCHW

    # Primary instantiation: Permute(0, 2, 3, 1)  (NCHW -> NHWC).
    # Called eagerly so the lane-dense probe can fall back safely if needed.
    dims = (0, 2, 3, 1)
    out = make_permute(*dims)(x)
    jax.block_until_ready(out)
    ref = jnp.transpose(x, dims)
    assert out.shape == ref.shape and out.dtype == ref.dtype
    assert bool(jnp.array_equal(out, ref)), "NCHW->NHWC permute mismatch"

    # Pure-relayout path (trailing axes unmoved): Permute(1, 0, 2, 3).
    dims2 = (1, 0, 2, 3)
    out2 = make_permute(*dims2)(x)
    jax.block_until_ready(out2)
    ref2 = jnp.transpose(x, dims2)
    assert out2.shape == ref2.shape
    assert bool(jnp.array_equal(out2, ref2)), "leading-axes permute mismatch"

    print("KERNEL_OK")
</pallas_src>

<mosaic_0001>
module attributes {stable_mosaic.version = 11 : i64} {
  func.func @_nchw_to_nhwc_lane_dense_kernel(%arg0: i32, %arg1: i32, %arg2: i32, %arg3: memref<1x4x16x16xf32, #tpu.memory_space<vmem>>, %arg4: memref<1x16x64xf32, #tpu.memory_space<vmem>>) attributes {dimension_semantics = [#tpu.dimension_semantics<parallel>, #tpu.dimension_semantics<parallel>, #tpu.dimension_semantics<parallel>], iteration_bounds = array<i64: 2, 1, 1>, scalar_prefetch = 0 : i64, scratch_operands = 0 : i64, tpu.core_type = #tpu.core_type<tc>, window_params = [{transform_indices = @transform_0, window_bounds = array<i64: 1, 4, 16, 16>}, {transform_indices = @transform_1, window_bounds = array<i64: 1, 16, 64>}]} {
    %c0 = arith.constant 0 : index
    %c0_0 = arith.constant 0 : index
    %c0_1 = arith.constant 0 : index
    %c0_2 = arith.constant 0 : index
    %0 = vector.load %arg3[%c0, %c0_0, %c0_1, %c0_2] : memref<1x4x16x16xf32, #tpu.memory_space<vmem>>, vector<1x4x16x16xf32>
    %1 = vector.shape_cast %0 : vector<1x4x16x16xf32> to vector<4x16x16xf32>
    %2 = tpu.transpose %1, [1, 2, 0] : vector<4x16x16xf32> -> vector<16x16x4xf32>
    %3 = vector.shape_cast %2 : vector<16x16x4xf32> to vector<16x64xf32>
    %c0_3 = arith.constant 0 : index
    %c0_4 = arith.constant 0 : index
    %c0_5 = arith.constant 0 : index
    %4 = vector.load %arg4[%c0_3, %c0_4, %c0_5] : memref<1x16x64xf32, #tpu.memory_space<vmem>>, vector<1x16x64xf32>
    %5 = vector.shape_cast %4 : vector<1x16x64xf32> to vector<16x64xf32>
    %6 = vector.shape_cast %3 : vector<16x64xf32> to vector<1x16x64xf32>
    tpu.vector_store %arg4[%c0_3, %c0_4, %c0_5], %6 {strides = array<i32>} : memref<1x16x64xf32, #tpu.memory_space<vmem>>, vector<1x16x64xf32>,
    return
  }
  func.func @transform_0(%arg0: i32, %arg1: i32, %arg2: i32) -> (i32, i32, i32, i32) {
    %c0_i32 = arith.constant 0 : i32
    %c0_i32_0 = arith.constant 0 : i32
    return %arg0, %c0_i32, %arg1, %arg2 : i32, i32, i32, i32
  }
  func.func @transform_1(%arg0: i32, %arg1: i32, %arg2: i32) -> (i32, i32, i32) {
    %c0_i32 = arith.constant 0 : i32
    return %arg0, %arg1, %arg2 : i32, i32, i32
  }
}

module attributes {stable_mosaic.version = 11 : i64} {
  func.func @_nchw_to_nhwc_blocked_kernel(%arg0: i32, %arg1: i32, %arg2: i32, %arg3: i32, %arg4: memref<1x4x16x16xf32, #tpu.memory_space<vmem>>, %arg5: memref<1x16x16x4xf32, #tpu.memory_space<vmem>>) attributes {dimension_semantics = [#tpu.dimension_semantics<parallel>, #tpu.dimension_semantics<parallel>, #tpu.dimension_semantics<parallel>, #tpu.dimension_semantics<parallel>], iteration_bounds = array<i64: 2, 1, 1, 1>, scalar_prefetch = 0 : i64, scratch_operands = 0 : i64, tpu.core_type = #tpu.core_type<tc>, window_params = [{transform_indices = @transform_0, window_bounds = array<i64: 1, 4, 16, 16>}, {transform_indices = @transform_1, window_bounds = array<i64: 1, 16, 16, 4>}]} {
    %c0 = arith.constant 0 : index
    %c0_0 = arith.constant 0 : index
    %c0_1 = arith.constant 0 : index
    %c0_2 = arith.constant 0 : index
    %0 = vector.load %arg4[%c0, %c0_0, %c0_1, %c0_2] : memref<1x4x16x16xf32, #tpu.memory_space<vmem>>, vector<1x4x16x16xf32>
    %1 = vector.shape_cast %0 : vector<1x4x16x16xf32> to vector<4x16x16xf32>
    %2 = tpu.transpose %1, [1, 2, 0] : vector<4x16x16xf32> -> vector<16x16x4xf32>
    %c0_3 = arith.constant 0 : index
    %c0_4 = arith.constant 0 : index
    %c0_5 = arith.constant 0 : index
    %c0_6 = arith.constant 0 : index
    %3 = vector.load %arg5[%c0_3, %c0_4, %c0_5, %c0_6] : memref<1x16x16x4xf32, #tpu.memory_space<vmem>>, vector<1x16x16x4xf32>
    %4 = vector.shape_cast %3 : vector<1x16x16x4xf32> to vector<16x16x4xf32>
    %5 = vector.shape_cast %2 : vector<16x16x4xf32> to vector<1x16x16x4xf32>
    tpu.vector_store %arg5[%c0_3, %c0_4, %c0_5, %c0_6], %5 {strides = array<i32>} : memref<1x16x16x4xf32, #tpu.memory_space<vmem>>, vector<1x16x16x4xf32>,
    return
  }
  func.func @transform_0(%arg0: i32, %arg1: i32, %arg2: i32, %arg3: i32) -> (i32, i32, i32, i32) {
    %c0_i32 = arith.constant 0 : i32
    return %arg0, %arg1, %arg2, %arg3 : i32, i32, i32, i32
  }
  func.func @transform_1(%arg0: i32, %arg1: i32, %arg2: i32, %arg3: i32) -> (i32, i32, i32, i32) {
    %c0_i32 = arith.constant 0 : i32
    return %arg0, %arg2, %arg3, %arg1 : i32, i32, i32, i32
  }
}

</mosaic_0001>

<bundles_post_ra>
// kernel: tpu_custom_call.1
= control target key start
LH: loop header
LB: loop body
LE: loop exit
PB: predicated region body
PF: predicated region fallthrough
CT: control target
= control target key end

     0   :  { %6 = vsyncpa [#allocation3], 0  ;;  %s3034_s0 = inlined_call_operand.hbm [shape: f32[2,4,16,16], index: 0, kind: input, shape index: {}]   ;;  %s3035_s1 = inlined_call_operand.hbm [shape: f32[2,16,64], index: 1, kind: output, shape index: {}]  }
   0x1   :  { %8 = vsyncpa [#allocation3 + $0x1], 0 }
   0x2   :  { %9 = vsyncpa [#allocation4], 0 }
   0x3   :  { %11 = vsyncpa [#allocation4 + $0x1], 0  ;;  %s2591_s6 = smov 0   ;;  %s2593_s7 = smov 0  }
   0x4   :  { %s2595_s8 = smov 0   ;;  %s2597_s9 = smov 0  }
   0x5   :  { %s2599_s10 = smov 0   ;;  %s2601_s11 = smov 0  }
   0x6 LB: > { %s2316_s12 = sadd.s32 4294967295, %s2556_s11   ;;  %s2317_s13 = sadd.s32 4294967294, %s2556_s11   ;;  %s2556_s11 = sphi %s2601_s11, %s17_s11   ;;  %s2552_s10 = sphi %s2599_s10, %s3046_s10   ;;  %s2548_s9 = sphi %s2597_s9, %s3045_s9   ;;  %s2544_s8 = sphi %s2595_s8, %s3044_s8   ;;  %s2540_s7 = sphi %s2593_s7, %s3043_s7   ;;  %s2536_s6 = sphi %s2591_s6, %s3042_s6  }
   0x7   : > { %s36_s14 = sadd.s32 1, %s2552_s10  ;;  %s47_s15 = sadd.s32 1, %s2544_s8 }
   0x8   : > { %p38_p0 = scmp.ge.s32.totalorder %s36_s14, 2  ;;  %p54_p1 = scmp.ne.s32.totalorder %s2544_s8, %s2540_s7 }
   0x9   : > { %p55_p2 = scmp.eq.s32.totalorder %s2556_s11, 0  ;;  %p60_p3 = scmp.ne.s32.totalorder %s2540_s7, %s2536_s6 }
   0xa   : > { %s3048_s14 = smov (%p38_p0, %s36_s14), 0  ;;  %p61_p5 = scmp.eq.s32.totalorder %s2316_s12, 0 }
   0xb   : > { %p2632_p4 = por %p55_p2, %p54_p1  ;;  %s40_s17 = ssub.s32 %s2552_s10, %s3048_s14 }
   0xc   : > { %p88_p6 = scmp.eq.s32.totalorder %s2316_s12, 1  ;;  %p45_p7 = scmp.eq.s32.totalorder %s40_s17, 0 }
   0xd   : > { %p2638_p8 = por %p61_p5, %p60_p3  ;;  %p94_p10 = scmp.eq.s32.totalorder %s2317_s13, 1 }
   0xe   : > { %p2642_p9 = por %p88_p6, %p54_p1  ;;  %p2377_p13 = scmp.lt.s32.totalorder %s2556_s11, 2 }
   0xf   : > { %s2647_s20 = scalar_select %p45_p7, %s2544_s8, %s47_s15  }
  0x10   : > { %p2649_p11 = por %p94_p10, %p60_p3  ;;  %s114_s22 = sand.u32 1, %s2544_s8  }
  0x11   : > { %s2320_s23 = sshll.u32 %s114_s22, 6  ;;  %s2363_s24 = sshll.u32 %s2552_s10, 10 }
  0x12   : > { %s127_s27 = scalar_lea.hbm %s3034_s0, %s2363_s24  ;;  %s118_s28 = scalar_lea.vmem [#allocation2], %s2320_s23 }
  0x13   : > { %s128_s29 = sshll.u32 %s118_s28, 4  ;;  %p2662_p0 = pnand %p2377_p13, %p2632_p4  ;;  %s129_s29 = int_to_ptr.vmem [resolvable:$true] %s128_s29 }
  0x14   : > { %p2323_p1 = scmp.ge.s32.totalorder %s2556_s11, 1  ;;  %s115_s2 = scalar_lea.sflag [#allocation3], %s114_s22 }
  0x15   : > { %p2450_p2 = pneg %p2662_p0  ;;  %s2461_s3 = scalar_lea.vmem %s129_s29, 1024 }
  0x16   : > { %p2462_p3 = scmp.ne.s32.totalorder %s129_s29, %s2461_s3  ;;  %s2558_s4 = smov [#allocation2]  }
  0x17   : > { %s2466_s5 = sshll.u32 %s2558_s4, 4  ;;  %s2467_s5 = int_to_ptr.vmem [resolvable:$false] %s2466_s5 }
  0x18   : > { %p2464_p5 = pnand %p2462_p3, %p2450_p2  ;;  %s2468_s12 = scalar_lea.vmem %s2467_s5, 2048 }
  0x19   : > { %p2469_p7 = scmp.lt.s32.totalorder %s129_s29, %s2467_s5  ;;  %p2470_p10 = scmp.lt.s32.totalorder %s2468_s12, %s2461_s3 }
  0x1a   : > { %p2465_p6 = pneg %p2464_p5 }
  0x1b   : > { %p2471_p12 = por %p2470_p10, %p2469_p7 }
  0x1d   : > { %p2472_p4 = pnand %p2471_p12, %p2465_p6 }
  0x1f   : > { %2475 = shalt.err (!%p2472_p4)
}
  0x20   : > { %s2559_s13 = smov 128   ;;  %s2560_s15 = smov 8  }
  0x21   : > { %2372 = dma.hbm_to_vmem [thread:$0]  (!%p2662_p0), %s127_s27, 1024, %s129_s29, %s115_s2, %s2559_s13, %s2559_s13, %s2560_s15  }
  0x22   : > { %p136_p13 = scmp.lt.s32.totalorder %s2556_s11, 3 }
  0x24   : > { %p137_p2 = pnand %p2323_p1, %p136_p13 }
  0x25   : > { %s2675_s16 = sand.u32 (!%p137_p2), 1, %s2540_s7  }
  0x26   : > { %140 = sbr.rel (%p137_p2) target bundleno = 546 (0x222), region = 24  ;;  %s2324_s17 = sshll.u32 (!%p137_p2), %s2675_s16, 6 }
  0x27   : > { %s143_s22 = scalar_lea.sflag (!%p137_p2), [#allocation3], %s2675_s16  ;;  %s146_s23 = scalar_lea.vmem (!%p137_p2), [#allocation2], %s2324_s17 }
  0x2b   : > { %2527 = dma.done.wait (%p2638_p8), %s143_s22, 1024  }
  0x2c   : > { %2529 = vsyncadd (%p2638_p8), %s143_s22, 4294966272  ;;  %v169_v0 = vld [vmem:[%s146_s23 + $0x10] sm:$0xff]  ;;  %v167_v1 = vld [vmem:[%s146_s23] sm:$0xff]  ;;  %v2561_v8 = vmov 1983009808   ;;  %v308_v10 = vlaneseq  ;;  %v2563_v35 = vmov 0.0  }
  0x2d   : > { %207 = vxpose.xlu1.b32.start [1/2] (short) (narrow) %v169_v0, 16  ;;  %175 = vxpose.xlu0.b32.start [1/2] (short) (narrow) %v167_v1, 16  ;;  %v170_v2 = vld [vmem:[%s146_s23 + $0x18] sm:$0xff]  ;;  %v168_v3 = vld [vmem:[%s146_s23 + $0x8] sm:$0xff]  ;;  %v173_v4 = vld [vmem:[%s146_s23 + $0x30] sm:$0xff]  ;;  %v306_v9 = vunpack.c.l.s4 %v2561_v8  ;;  %s2564_s18 = smov 8  }
  0x2e   : > { %v171_v5 = vld [vmem:[%s146_s23 + $0x20] sm:$0xff]  ;;  %v174_v6 = vld [vmem:[%s146_s23 + $0x38] sm:$0xff]  ;;  %v172_v7 = vld [vmem:[%s146_s23 + $0x28] sm:$0xff]  ;;  %v309_v14 = vshrl.u32 %v308_v10, 7  ;;  %v2562_v17 = vmov 1934713408  }
  0x2f   : > { %v307_v13 = vunpack.c.0.s8 %v306_v9  ;;  %v338_v18 = vunpack.c.l.s4 %v2562_v17  ;;  %s2565_s24 = smov 4   ;;  %s2566_s25 = smov 12   ;;  %vm2159_vm0 = vcmask 31744   ;;  %vm2162_vm1 = vcmask 64512  }
  0x30   : > { %s2567_s26 = smov 16   ;;  %s2568_s27 = smov 20   ;;  %vm2165_vm2 = vcmask 97280   ;;  %vm2168_vm3 = vcmask 130048   ;;  %vm2171_vm4 = vcmask 162816   ;;  %vm2174_vm5 = vcmask 195584  }
  0x31   : > { %208 = vxpose.xlu1.b32.end [2/2] (short) (narrow) %v170_v2, 16  ;;  %176 = vxpose.xlu0.b32.end [2/2] (short) (narrow) %v168_v3, 16  ;;  %v2683_v19 = vsub.s32 %v307_v13, %v309_v14  ;;  %v339_v22 = vunpack.c.0.s8 %v338_v18  ;;  %s2569_s28 = smov 24   ;;  %s2570_s29 = smov 28   ;;  %vm2177_vm6 = vcmask 228352   ;;  %vm2180_vm7 = vcmask 261120  }
  0x32   : > { %s2571_s30 = smov 32   ;;  %s2572_s2 = smov 36   ;;  %vm2183_vm8 = vcmask 293888   ;;  %vm2186_vm9 = vcmask 326656   ;;  %vm2189_vm10 = vcmask 359424   ;;  %vm2192_vm11 = vcmask 392192  }
  0x33   : > { %v2687_v29 = vsub.s32 %v339_v22, %v309_v14  ;;  %s2573_s3 = smov 40   ;;  %s2574_s4 = smov 44   ;;  %vm2195_vm12 = vcmask 424960   ;;  %vm2198_vm13 = vcmask 457728   ;;  %vm2201_vm14 = vcmask 490496  }
  0x34   : > { %s2575_s5 = smov 48   ;;  %s2576_s12 = smov 52   ;;  %vm2204_vm15 = vcmask 523264  }
  0x35   : > { %271 = vxpose.xlu1.b32.start [1/2] (short) (narrow) %v173_v4, 16  ;;  %239 = vxpose.xlu0.b32.start [1/2] (short) (narrow) %v171_v5, 16  ;;  %s2577_s13 = smov 56   ;;  %s2578_s15 = smov 60  }
  0x36   : > { %s2325_s17 = sshll.u32 %s2675_s16, 4 }
  0x37   : > { %s164_s22 = scalar_lea.vmem [#allocation5], %s2325_s17 }
  0x38   : > { %s2224_s23 = sshll.u32 %s164_s22, 4  ;;  %s2977_s23 = int_to_ptr.vmem [resolvable:$true] %s2224_s23 }
  0x39   : > { %272 = vxpose.xlu1.b32.end [2/2] (short) (narrow) %v174_v6, 16  ;;  %240 = vxpose.xlu0.b32.end [2/2] (short) (narrow) %v172_v7, 16 }
  0xa9   : > { %v223_v11 = vpop.trf.xlu1  ;;  %v191_v12 = vpop.trf.xlu0 }
  0xad   : > { %v224_v15 = vpop.trf.xlu1  ;;  %v192_v16 = vpop.trf.xlu0 }
  0xb1   : > { %v287_v20 = vpop.trf.xlu1  ;;  %v255_v21 = vpop.trf.xlu0 }
  0xb2   : > { %v319_v23 = vcombine.low %v223_v11, %v287_v20  ;;  %v303_v24 = vcombine.low %v191_v12, %v255_v21  ;;  %v320_v27 = vcombine.high %v223_v11, %v287_v20  ;;  %v304_v28 = vcombine.high %v191_v12, %v255_v21 }
  0xb4   : > { %v327_v25 = vrot.slane %v319_v23, %v2683_v19  ;;  %v311_v26 = vrot.slane %v303_v24, %v2683_v19  ;;  %v334_v32 = vrot.slane %v320_v27, %v2683_v19  ;;  %v318_v33 = vrot.slane %v304_v28, %v2683_v19 }
  0xb5   : > { %v288_v37 = vpop.trf.xlu1  ;;  %v256_v38 = vpop.trf.xlu0 }
  0xb6   : > { %v335_v30 = vcombine.low %v311_v26, %v327_v25  ;;  %v336_v31 = vcombine.high %v311_v26, %v327_v25  ;;  %v351_v40 = vcombine.low %v318_v33, %v334_v32  ;;  %v387_v41 = vcombine.low %v224_v15, %v288_v37 }
  0xb7   : > { %v371_v42 = vcombine.low %v192_v16, %v256_v38  ;;  %v352_v45 = vcombine.high %v318_v33, %v334_v32  ;;  %v388_v51 = vcombine.high %v224_v15, %v288_v37  ;;  %v372_v52 = vcombine.high %v192_v16, %v256_v38 }
  0xb8   : > { %v343_v34 = vrot.slane %v335_v30, %v2687_v29  ;;  %v350_v39 = vrot.slane %v336_v31, %v2687_v29  ;;  %v359_v44 = vrot.slane %v351_v40, %v2687_v29  ;;  %v395_v46 = vrot.slane %v387_v41, %v2683_v19 }
  0xb9   : > { %v379_v47 = vrot.slane %v371_v42, %v2683_v19  ;;  %v366_v49 = vrot.slane %v352_v45, %v2687_v29  ;;  %v402_v56 = vrot.slane %v388_v51, %v2683_v19  ;;  %v386_v57 = vrot.slane %v372_v52, %v2683_v19 }
  0xba   : > { %439 = vxpose.xlu0.b32.start.end [1/1] (short) (narrow) %v343_v34, 16  ;;  %v367_v36 = vcombine.high %v343_v34, %v2563_v35  ;;  %v368_v43 = vcombine.high %v350_v39, %v2563_v35  ;;  %v369_v48 = vcombine.high %v359_v44, %v2563_v35 }
  0xbb   : > { %v403_v50 = vcombine.low %v379_v47, %v395_v46  ;;  %v370_v53 = vcombine.high %v366_v49, %v2563_v35  ;;  %v404_v55 = vcombine.high %v379_v47, %v395_v46  ;;  %v419_v60 = vcombine.low %v386_v57, %v402_v56 }
  0xbc   : > { %471 = vxpose.xlu1.b32.start.end [1/1] (short) (narrow) %v367_v36, 16  ;;  %v420_v63 = vcombine.high %v386_v57, %v402_v56 }
  0xbd   : > { %v411_v54 = vrot.slane %v403_v50, %v2687_v29  ;;  %v418_v59 = vrot.slane %v404_v55, %v2687_v29  ;;  %v427_v62 = vrot.slane %v419_v60, %v2687_v29 }
  0xbe   : > { %v434_v1 = vrot.slane %v420_v63, %v2687_v29 }
  0xbf   : > { %503 = vxpose.xlu0.b32.start.end [1/1] (short) (narrow) %v350_v39, 16  ;;  %v435_v58 = vcombine.high %v411_v54, %v2563_v35  ;;  %v436_v61 = vcombine.high %v418_v59, %v2563_v35  ;;  %v437_v0 = vcombine.high %v427_v62, %v2563_v35 }
  0xc0   : > { %v438_v2 = vcombine.high %v434_v1, %v2563_v35 }
  0xc1   : > { %535 = vxpose.xlu1.b32.start.end [1/1] (short) (narrow) %v368_v43, 16 }
  0xc4   : > { %567 = vxpose.xlu0.b32.start.end [1/1] (short) (narrow) %v359_v44, 16 }
  0xc6   : > { %599 = vxpose.xlu1.b32.start.end [1/1] (short) (narrow) %v369_v48, 16 }
  0xc9   : > { %631 = vxpose.xlu0.b32.start.end [1/1] (short) (narrow) %v366_v49, 16 }
  0xcb   : > { %663 = vxpose.xlu1.b32.start.end [1/1] (short) (narrow) %v370_v53, 16 }
  0xce   : > { %695 = vxpose.xlu0.b32.start.end [1/1] (short) (narrow) %v411_v54, 16 }
  0xd0   : > { %727 = vxpose.xlu1.b32.start.end [1/1] (short) (narrow) %v435_v58, 16 }
  0xd3   : > { %759 = vxpose.xlu0.b32.start.end [1/1] (short) (narrow) %v418_v59, 16 }
  0xd5   : > { %791 = vxpose.xlu1.b32.start.end [1/1] (short) (narrow) %v436_v61, 16 }
  0xd8   : > { %823 = vxpose.xlu0.b32.start.end [1/1] (short) (narrow) %v427_v62, 16 }
  0xda   : > { %855 = vxpose.xlu1.b32.start.end [1/1] (short) (narrow) %v437_v0, 16 }
  0xdd   : > { %887 = vxpose.xlu0.b32.start.end [1/1] (short) (narrow) %v434_v1, 16 }
  0xdf   : > { %919 = vxpose.xlu1.b32.start.end [1/1] (short) (narrow) %v438_v2, 16 }
 0x136   : > { %v455_v3 = vpop.trf.xlu0 }
 0x138   : > { %v487_v4 = vpop.trf.xlu1 }
 0x13a   : > { %v456_v5 = vpop.trf.xlu0 }
 0x13c   : > { %v488_v6 = vpop.trf.xlu1 }
 0x13e   : > { %v519_v7 = vpop.trf.xlu0 }
 0x13f   : > { %v951_v8 = vcombine.low %v455_v3, %v519_v7  ;;  %v952_v9 = vcombine.high %v455_v3, %v519_v7 }
 0x140   : > { %v551_v10 = vpop.trf.xlu1 }
 0x141   : > { %v967_v11 = vcombine.low %v487_v4, %v551_v10  ;;  %v968_v12 = vcombine.high %v487_v4, %v551_v10  ;;  %v959_v14 = vrot.slane %v951_v8, %v2683_v19  ;;  %v966_v15 = vrot.slane %v952_v9, %v2683_v19 }
 0x142   : > { %v520_v13 = vpop.trf.xlu0 }
 0x143   : > { %v975_v16 = vrot.slane %v967_v11, %v2683_v19  ;;  %v982_v17 = vrot.slane %v968_v12, %v2683_v19  ;;  %v1223_v18 = vcombine.low %v456_v5, %v520_v13  ;;  %v1224_v20 = vcombine.high %v456_v5, %v520_v13 }
 0x144   : > { %v552_v21 = vpop.trf.xlu1 }
 0x145   : > { %v1015_v22 = vcombine.low %v959_v14, %v975_v16  ;;  %v1016_v23 = vcombine.high %v959_v14, %v975_v16  ;;  %v1031_v24 = vcombine.low %v966_v15, %v982_v17  ;;  %v1032_v25 = vcombine.high %v966_v15, %v982_v17 }
 0x146   : > { %v1239_v26 = vcombine.low %v488_v6, %v552_v21  ;;  %v1240_v27 = vcombine.high %v488_v6, %v552_v21  ;;  %v583_v28 = vpop.trf.xlu0  ;;  %v1231_v34 = vrot.slane %v1223_v18, %v2683_v19  ;;  %v1238_v35 = vrot.slane %v1224_v20, %v2683_v19 }
 0x147   : > { %v1023_v30 = vrot.slane %v1015_v22, %v2687_v29  ;;  %v1030_v31 = vrot.slane %v1016_v23, %v2687_v29  ;;  %v1039_v32 = vrot.slane %v1031_v24, %v2687_v29  ;;  %v1046_v33 = vrot.slane %v1032_v25, %v2687_v29 }
 0x148   : > { %v1247_v36 = vrot.slane %v1239_v26, %v2683_v19  ;;  %v1254_v37 = vrot.slane %v1240_v27, %v2683_v19  ;;  %v615_v38 = vpop.trf.xlu1 }
 0x149   : > { %v2326_v39 = vcombine.low %v1023_v30, %v1030_v31  ;;  %v2328_v40 = vcombine.high %v1023_v30, %v1030_v31  ;;  %v2330_v41 = vcombine.low %v1039_v32, %v1046_v33  ;;  %v2332_v42 = vcombine.high %v1039_v32, %v1046_v33 }
 0x14a   : > { %v1287_v43 = vcombine.low %v1231_v34, %v1247_v36  ;;  %v1288_v44 = vcombine.high %v1231_v34, %v1247_v36  ;;  %v1303_v45 = vcombine.low %v1238_v35, %v1254_v37  ;;  %v1304_v46 = vcombine.high %v1238_v35, %v1254_v37  ;;  %v584_v47 = vpop.trf.xlu0 }
 0x14b   : > { %v1503_v48 = vrot.slane %v2326_v39, %v2683_v19  ;;  %v1519_v49 = vrot.slane %v2328_v40, %v2683_v19  ;;  %v1535_v50 = vrot.slane %v2330_v41, %v2683_v19  ;;  %v1551_v51 = vrot.slane %v2332_v42, %v2683_v19 }
 0x14c   : > { %v1295_v52 = vrot.slane %v1287_v43, %v2687_v29  ;;  %v1302_v53 = vrot.slane %v1288_v44, %v2687_v29  ;;  %v1311_v54 = vrot.slane %v1303_v45, %v2687_v29  ;;  %v1318_v55 = vrot.slane %v1304_v46, %v2687_v29  ;;  %v616_v56 = vpop.trf.xlu1 }
 0x14d   : > { %v1560_v57 = vcombine.high %v1503_v48, %v1519_v49  ;;  %v1592_v58 = vcombine.high %v1535_v50, %v1551_v51  ;;  %v1559_v59 = vcombine.low %v1503_v48, %v1519_v49  ;;  %v1591_v60 = vcombine.low %v1535_v50, %v1551_v51 }
 0x14e   : > { %v2334_v61 = vcombine.low %v1295_v52, %v1302_v53  ;;  %v2336_v62 = vcombine.high %v1295_v52, %v1302_v53  ;;  %v2338_v63 = vcombine.low %v1311_v54, %v1318_v55  ;;  %v2340_v0 = vcombine.high %v1311_v54, %v1318_v55  ;;  %v647_v1 = vpop.trf.xlu0 }
 0x14f   : > { %v983_v2 = vcombine.low %v583_v28, %v647_v1  ;;  %v984_v3 = vcombine.high %v583_v28, %v647_v1  ;;  %v1574_v4 = vrot.slane %v1560_v57, %v2687_v29  ;;  %v1606_v5 = vrot.slane %v1592_v58, %v2687_v29 }
 0x150   : > { %v679_v6 = vpop.trf.xlu1  ;;  %v2726_v7 = vrot.slane %v1559_v59, %v2687_v29  ;;  %v2729_v8 = vrot.slane %v1591_v60, %v2687_v29  ;;  %v2732_v9 = vrot.slane %v2334_v61, %v2683_v19  ;;  %v2735_v10 = vrot.slane %v2336_v62, %v2683_v19 }
 0x151   : > { %v991_v11 = vrot.slane %v983_v2, %v2683_v19  ;;  %v999_v12 = vcombine.low %v615_v38, %v679_v6  ;;  %v1000_v13 = vcombine.high %v615_v38, %v679_v6  ;;  %v998_v14 = vrot.slane %v984_v3, %v2683_v19 }
 0x152   : > { %v648_v15 = vpop.trf.xlu0  ;;  %v1625_v16 = vcombine.low %v1574_v4, %v1606_v5  ;;  %v1624_v17 = vcombine.high %v2726_v7, %v2729_v8  ;;  %v1626_v18 = vcombine.high %v1574_v4, %v1606_v5  ;;  %v2746_v25 = vrot.slane %v2338_v63, %v2683_v19 }
 0x153   : > { %v1007_v20 = vrot.slane %v999_v12, %v2683_v19  ;;  %v1014_v21 = vrot.slane %v1000_v13, %v2683_v19  ;;  %v1255_v22 = vcombine.low %v584_v47, %v648_v15  ;;  %v1256_v23 = vcombine.high %v584_v47, %v648_v15 }
 0x154   : > { %2049 = vrot.lane.b32.xlu1 %v1625_v16, %s2564_s18  ;;  %2041 = vrot.lane.b32.xlu0 %v1624_v17, %s2565_s24  ;;  %v680_v24 = vpop.trf.xlu1  ;;  %v2749_v26 = vrot.slane %v2340_v0, %v2683_v19  ;;  %v1696_v27 = vcombine.high %v2732_v9, %v2735_v10 }
 0x155   : > { %v1047_v28 = vcombine.low %v991_v11, %v1007_v20  ;;  %v1048_v30 = vcombine.high %v991_v11, %v1007_v20  ;;  %v1063_v31 = vcombine.low %v998_v14, %v1014_v21  ;;  %v1064_v32 = vcombine.high %v998_v14, %v1014_v21 }
 0x156   : > { %v1263_v33 = vrot.slane %v1255_v22, %v2683_v19  ;;  %v1270_v34 = vrot.slane %v1256_v23, %v2683_v19  ;;  %v1271_v35 = vcombine.low %v616_v56, %v680_v24  ;;  %v1272_v36 = vcombine.high %v616_v56, %v680_v24  ;;  %v711_v37 = vpop.trf.xlu0 }
 0x157   : > { %v1055_v38 = vrot.slane %v1047_v28, %v2687_v29  ;;  %v1062_v39 = vrot.slane %v1048_v30, %v2687_v29  ;;  %v1071_v40 = vrot.slane %v1063_v31, %v2687_v29  ;;  %v1078_v41 = vrot.slane %v1064_v32, %v2687_v29 }
 0x158   : > { %v1279_v42 = vrot.slane %v1271_v35, %v2683_v19  ;;  %v1286_v43 = vrot.slane %v1272_v36, %v2683_v19  ;;  %2057 = vrot.lane.b32.xlu1 %v1626_v18, %s2566_s25  ;;  %v2763_v44 = vrot.slane %v1696_v27, %v2687_v29  ;;  %v1728_v45 = vcombine.high %v2746_v25, %v2749_v26  ;;  %v743_v46 = vpop.trf.xlu1 }
 0x159   : > { %v2327_v47 = vcombine.low %v1055_v38, %v1062_v39  ;;  %v2329_v48 = vcombine.high %v1055_v38, %v1062_v39  ;;  %v2331_v49 = vcombine.low %v1071_v40, %v1078_v41  ;;  %v2333_v50 = vcombine.high %v1071_v40, %v1078_v41 }
 0x15a   : > { %v1319_v51 = vcombine.low %v1263_v33, %v1279_v42  ;;  %v1320_v52 = vcombine.high %v1263_v33, %v1279_v42  ;;  %v1335_v53 = vcombine.low %v1270_v34, %v1286_v43  ;;  %v1336_v54 = vcombine.high %v1270_v34, %v1286_v43  ;;  %v712_v55 = vpop.trf.xlu0 }
 0x15b   : > { %v2768_v56 = vrot.slane %v1728_v45, %v2687_v29  ;;  %v2771_v57 = vrot.slane %v2327_v47, %v2683_v19  ;;  %v2774_v58 = vrot.slane %v2329_v48, %v2683_v19  ;;  %v2777_v59 = vrot.slane %v2331_v49, %v2683_v19 }
 0x15c   : > { %v1327_v60 = vrot.slane %v1319_v51, %v2687_v29  ;;  %v1334_v61 = vrot.slane %v1320_v52, %v2687_v29  ;;  %v1343_v62 = vrot.slane %v1335_v53, %v2687_v29  ;;  %v1350_v63 = vrot.slane %v1336_v54, %v2687_v29  ;;  %v744_v0 = vpop.trf.xlu1 }
 0x15d   : > { %v1762_v1 = vcombine.high %v2763_v44, %v2768_v56  ;;  %v2786_v2 = vrot.slane %v2333_v50, %v2683_v19  ;;  %v1575_v3 = vcombine.low %v2771_v57, %v2774_v58  ;;  %v1576_v42 = vcombine.high %v2771_v57, %v2774_v58 }
 0x15e   : > { %v2335_v4 = vcombine.low %v1327_v60, %v1334_v61  ;;  %v2337_v5 = vcombine.high %v1327_v60, %v1334_v61  ;;  %v2339_v6 = vcombine.low %v1343_v62, %v1350_v63  ;;  %v2341_v11 = vcombine.high %v1343_v62, %v1350_v63  ;;  %v775_v12 = vpop.trf.xlu0 }
 0x15f   : > { %2059 = vrot.lane.b32.xlu0 %v1762_v1, %s2566_s25  ;;  %v1087_v13 = vcombine.low %v711_v37, %v775_v12  ;;  %v1088_v14 = vcombine.high %v711_v37, %v775_v12  ;;  %v1583_v15 = vrot.slane %v1575_v3, %v2687_v29  ;;  %v1607_v16 = vcombine.low %v2777_v59, %v2786_v2 }
 0x160   : > { %v807_v17 = vpop.trf.xlu1  ;;  %v2795_v18 = vrot.slane %v2335_v4, %v2683_v19  ;;  %v2798_v20 = vrot.slane %v2337_v5, %v2683_v19  ;;  %v2801_v21 = vrot.slane %v2339_v6, %v2683_v19  ;;  %v1694_v22 = vrot.slane %v2341_v11, %v2683_v19 }
 0x161   : > { %v1095_v23 = vrot.slane %v1087_v13, %v2683_v19  ;;  %v1103_v24 = vcombine.low %v743_v46, %v807_v17  ;;  %v1104_v27 = vcombine.high %v743_v46, %v807_v17  ;;  %v1102_v28 = vrot.slane %v1088_v14, %v2683_v19 }
 0x162   : > { %v776_v30 = vpop.trf.xlu0  ;;  %v1615_v31 = vrot.slane %v1607_v16, %v2687_v29  ;;  %v1711_v32 = vcombine.low %v2795_v18, %v2798_v20  ;;  %v1743_v33 = vcombine.low %v2801_v21, %v1694_v22  ;;  %v1608_v62 = vcombine.high %v2777_v59, %v2786_v2 }
 0x163   : > { %v1111_v34 = vrot.slane %v1103_v24, %v2683_v19  ;;  %v1118_v35 = vrot.slane %v1104_v27, %v2683_v19  ;;  %v1359_v36 = vcombine.low %v712_v55, %v776_v30  ;;  %v1360_v37 = vcombine.high %v712_v55, %v776_v30 }
 0x164   : > { %v1627_v38 = vcombine.low %v1583_v15, %v1615_v31  ;;  %v808_v39 = vpop.trf.xlu1  ;;  %v1719_v40 = vrot.slane %v1711_v32, %v2687_v29  ;;  %v1751_v41 = vrot.slane %v1743_v33, %v2687_v29  ;;  %v1628_v51 = vcombine.high %v1583_v15, %v1615_v31 }
 0x165   : > { %v1151_v43 = vcombine.low %v1095_v23, %v1111_v34  ;;  %v1152_v45 = vcombine.high %v1095_v23, %v1111_v34  ;;  %v1167_v46 = vcombine.low %v1102_v28, %v1118_v35  ;;  %v1168_v47 = vcombine.high %v1102_v28, %v1118_v35 }
 0x166   : > { %2065 = vrot.lane.b32.xlu1 %v1627_v38, %s2567_s26  ;;  %v1375_v48 = vcombine.low %v744_v0, %v808_v39  ;;  %v1376_v49 = vcombine.high %v744_v0, %v808_v39  ;;  %v839_v50 = vpop.trf.xlu0  ;;  %v1367_v54 = vrot.slane %v1359_v36, %v2683_v19  ;;  %v1374_v55 = vrot.slane %v1360_v37, %v2683_v19 }
 0x167   : > { %v2817_v52 = vrot.slane %v1151_v43, %v2687_v29  ;;  %v2820_v53 = vrot.slane %v1152_v45, %v2687_v29  ;;  %v1763_v60 = vcombine.low %v1719_v40, %v1751_v41  ;;  %v2829_v63 = vrot.slane %v1167_v46, %v2687_v29 }
 0x168   : > { %v1383_v57 = vrot.slane %v1375_v48, %v2683_v19  ;;  %v1390_v58 = vrot.slane %v1376_v49, %v2683_v19  ;;  %v871_v61 = vpop.trf.xlu1  ;;  %v2832_v0 = vrot.slane %v1168_v47, %v2687_v29  ;;  %v1590_v1 = vrot.slane %v1576_v42, %v2687_v29 }
 0x169   : > { %v1695_v3 = vcombine.low %v2732_v9, %v2735_v10  ;;  %v2342_v59 = vcombine.low %v2817_v52, %v2820_v53  ;;  %2067 = vrot.lane.b32.xlu0 %v1763_v60, %s2567_s26  ;;  %v1622_v2 = vrot.slane %v1608_v62, %v2687_v29  ;;  %v1712_v13 = vcombine.high %v2795_v18, %v2798_v20 }
 0x16a   : > { %v1423_v4 = vcombine.low %v1367_v54, %v1383_v57  ;;  %v1424_v5 = vcombine.high %v1367_v54, %v1383_v57  ;;  %v1439_v6 = vcombine.low %v1374_v55, %v1390_v58  ;;  %v1440_v11 = vcombine.high %v1374_v55, %v1390_v58  ;;  %2073 = vrot.lane.b32.xlu1 %v1628_v51, %s2568_s27  ;;  %v840_v12 = vpop.trf.xlu0 }
 0x16b   : > { %v1744_v14 = vcombine.high %v2801_v21, %v1694_v22  ;;  %v1629_v23 = vcombine.low %v1590_v1, %v1622_v2  ;;  %v1764_v24 = vcombine.high %v1719_v40, %v1751_v41  ;;  %v1726_v27 = vrot.slane %v1712_v13, %v2687_v29 }
 0x16c   : > { %v1431_v9 = vrot.slane %v1423_v4, %v2687_v29  ;;  %v1438_v10 = vrot.slane %v1424_v5, %v2687_v29  ;;  %v1447_v15 = vrot.slane %v1439_v6, %v2687_v29  ;;  %v1454_v16 = vrot.slane %v1440_v11, %v2687_v29  ;;  %v872_v17 = vpop.trf.xlu1 }
 0x16d   : > { %v1758_v28 = vrot.slane %v1744_v14, %v2687_v29  ;;  %v2344_v18 = vcombine.high %v2817_v52, %v2820_v53  ;;  %2075 = vrot.lane.b32.xlu0 %v1764_v24, %s2568_s27  ;;  %v1630_v33 = vcombine.high %v1590_v1, %v1622_v2  ;;  %v2852_v37 = vrot.slane %v1695_v3, %v2687_v29 }
 0x16e   : > { %v2350_v20 = vcombine.low %v1431_v9, %v1438_v10  ;;  %v2352_v21 = vcombine.high %v1431_v9, %v1438_v10  ;;  %v2354_v22 = vcombine.low %v1447_v15, %v1454_v16  ;;  %v903_v30 = vpop.trf.xlu0  ;;  %2081 = vrot.lane.b32.xlu1 %v1629_v23, %s2569_s28  ;;  %v2356_v34 = vcombine.high %v1447_v15, %v1454_v16 }
 0x16f   : > { %v1119_v31 = vcombine.low %v839_v50, %v903_v30  ;;  %v1120_v32 = vcombine.high %v839_v50, %v903_v30  ;;  %v1765_v35 = vcombine.low %v1726_v27, %v1758_v28  ;;  %v1727_v38 = vcombine.low %v2746_v25, %v2749_v26 }
 0x170   : > { %v935_v36 = vpop.trf.xlu1  ;;  %v2862_v46 = vrot.slane %v2350_v20, %v2683_v19  ;;  %v2865_v47 = vrot.slane %v2352_v21, %v2683_v19  ;;  %v2868_v48 = vrot.slane %v2354_v22, %v2683_v19  ;;  %v1959_v55 = vrot.slane %v2356_v34, %v2683_v19 }
 0x171   : > { %v1127_v39 = vrot.slane %v1119_v31, %v2683_v19  ;;  %v1134_v40 = vrot.slane %v1120_v32, %v2683_v19  ;;  %v1135_v41 = vcombine.low %v871_v61, %v935_v36  ;;  %v1136_v42 = vcombine.high %v871_v61, %v935_v36  ;;  %2083 = vrot.lane.b32.xlu0 %v1765_v35, %s2569_s28  ;;  %s2476_s28 = scalar_lea.vmem %s2977_s23, 256 }
 0x172   : > { %v904_v43 = vpop.trf.xlu0  ;;  %v2859_v45 = vrot.slane %v1727_v38, %v2687_v29  ;;  %2089 = vrot.lane.b32.xlu1 %v1630_v33, %s2570_s29  ;;  %v1967_v57 = vcombine.low %v2862_v46, %v2865_v47  ;;  %v2346_v1 = vcombine.low %v2829_v63, %v2832_v0  ;;  %v1766_v3 = vcombine.high %v1726_v27, %v1758_v28  ;;  %p2477_p8 = scmp.ne.s32.totalorder %s2977_s23, %s2476_s28 }
 0x173   : > { %v1143_v25 = vrot.slane %v1135_v41, %v2683_v19  ;;  %v1150_v26 = vrot.slane %v1136_v42, %v2683_v19  ;;  %v1391_v49 = vcombine.low %v840_v12, %v904_v43  ;;  %v1392_v50 = vcombine.high %v840_v12, %v904_v43 }
 0x174   : > { %v1760_v51 = vcombine.high %v2852_v37, %v2859_v45  ;;  %v936_v54 = vpop.trf.xlu1  ;;  %v2348_v6 = vcombine.high %v2829_v63, %v2832_v0  ;;  %v1761_v2 = vcombine.low %v2763_v44, %v2768_v56  ;;  %v1999_v10 = vcombine.low %v2868_v48, %v1959_v55  ;;  %p2478_p12 = pnand %p2477_p8, %p2642_p9 }
 0x175   : > { %v1183_v58 = vcombine.low %v1127_v39, %v1143_v25  ;;  %v1184_v60 = vcombine.high %v1127_v39, %v1143_v25  ;;  %v1199_v61 = vcombine.low %v1134_v40, %v1150_v26  ;;  %v1200_v62 = vcombine.high %v1134_v40, %v1150_v26  ;;  %2091 = vrot.lane.b32.xlu0 %v1766_v3, %s2570_s29  ;;  %s2579_s29 = smov [#allocation5]  }
 0x176   : > { %v1407_v4 = vcombine.low %v872_v17, %v936_v54  ;;  %v1408_v5 = vcombine.high %v872_v17, %v936_v54  ;;  %v1399_v11 = vrot.slane %v1391_v49, %v2683_v19  ;;  %v1406_v12 = vrot.slane %v1392_v50, %v2683_v19  ;;  %2043 = vrot.lane.b32.xlu1 %v1760_v51, %s2565_s24  ;;  %s2364_s24 = sshll.u32 %s2548_s9, 8  ;;  %s2208_s9 = scalar_lea.sflag [#allocation4], %s2675_s16 }
 0x177   : > { %v2887_v13 = vrot.slane %v1183_v58, %v2687_v29  ;;  %v1198_v63 = vrot.slane %v1184_v60, %v2687_v29  ;;  %v1207_v0 = vrot.slane %v1199_v61, %v2687_v29  ;;  %v1214_v15 = vrot.slane %v1200_v62, %v2687_v29  ;;  %s2983_s27 = scalar_lea.hbm %s3035_s1, %s2364_s24  ;;  %p2479_p0 = pneg %p2478_p12 }
 0x178   : > { %v1415_v14 = vrot.slane %v1407_v4, %v2683_v19  ;;  %v1422_v9 = vrot.slane %v1408_v5, %v2683_v19  ;;  %v1975_v16 = vrot.slane %v1967_v57, %v2687_v29  ;;  %v2007_v24 = vrot.slane %v1999_v10, %v2687_v29 }
 0x179   : > { %v1775_v27 = vrot.slane %v2342_v59, %v2683_v19  ;;  %v1791_v28 = vrot.slane %v2344_v18, %v2683_v19  ;;  %v1807_v20 = vrot.slane %v2346_v1, %v2683_v19  ;;  %v1823_v33 = vrot.slane %v2348_v6, %v2683_v19 }
 0x17a   : > { %v1455_v17 = vcombine.low %v1399_v11, %v1415_v14  ;;  %v1456_v44 = vcombine.high %v1399_v11, %v1415_v14  ;;  %v1471_v56 = vcombine.low %v1406_v12, %v1422_v9  ;;  %v1472_v23 = vcombine.high %v1406_v12, %v1422_v9  ;;  %2051 = vrot.lane.b32.xlu1 %v1761_v2, %s2564_s18 }
 0x17b   : > { %v2031_v32 = vcombine.low %v1975_v16, %v2007_v24  ;;  %v1831_v34 = vcombine.low %v1775_v27, %v1791_v28  ;;  %v2032_v59 = vcombine.high %v1975_v16, %v2007_v24  ;;  %v1863_v18 = vcombine.low %v1807_v20, %v1823_v33 }
 0x17c   : > { %v1463_v21 = vrot.slane %v1455_v17, %v2687_v29  ;;  %v1470_v22 = vrot.slane %v1456_v44, %v2687_v29  ;;  %v1479_v30 = vrot.slane %v1471_v56, %v2687_v29  ;;  %v1486_v31 = vrot.slane %v1472_v23, %v2687_v29 }
 0x17d   : > { %2099 = vrot.lane.b32.xlu0 %v2031_v32, %s2571_s30  ;;  %v1839_v53 = vrot.slane %v1831_v34, %v2687_v29  ;;  %v1968_v39 = vcombine.high %v2862_v46, %v2865_v47  ;;  %v2000_v40 = vcombine.high %v2868_v48, %v1959_v55  ;;  %v1832_v41 = vcombine.high %v1775_v27, %v1791_v28 }
 0x17e   : > { %v2351_v35 = vcombine.low %v1463_v21, %v1470_v22  ;;  %v2353_v36 = vcombine.high %v1463_v21, %v1470_v22  ;;  %v2355_v38 = vcombine.low %v1479_v30, %v1486_v31  ;;  %v2357_v52 = vcombine.high %v1479_v30, %v1486_v31 }
 0x17f   : > { %v1864_v42 = vcombine.high %v1807_v20, %v1823_v33  ;;  %v1871_v26 = vrot.slane %v1863_v18, %v2687_v29  ;;  %v1982_v49 = vrot.slane %v1968_v39, %v2687_v29  ;;  %v2014_v50 = vrot.slane %v2000_v40, %v2687_v29 }
 0x180   : > { %v1918_v43 = vrot.slane %v2351_v35, %v2683_v19  ;;  %v1934_v25 = vrot.slane %v2353_v36, %v2683_v19  ;;  %v1950_v51 = vrot.slane %v2355_v38, %v2683_v19  ;;  %v2343_v54 = vcombine.low %v2887_v13, %v1198_v63 }
 0x181   : > { %v1966_v46 = vrot.slane %v2357_v52, %v2683_v19  ;;  %v2345_v48 = vcombine.high %v2887_v13, %v1198_v63  ;;  %v2347_v55 = vcombine.low %v1207_v0, %v1214_v15  ;;  %v2349_v57 = vcombine.high %v1207_v0, %v1214_v15  ;;  %2107 = vrot.lane.b32.xlu0 %v2032_v59, %s2572_s2 }
 0x182   : > { %v1983_v47 = vcombine.low %v1918_v43, %v1934_v25  ;;  %v1895_v58 = vcombine.low %v1839_v53, %v1871_v26  ;;  %v2033_v61 = vcombine.low %v1982_v49, %v2014_v50  ;;  %v1846_v62 = vrot.slane %v1832_v41, %v2687_v29 }
 0x183   : > { %v2015_v60 = vcombine.low %v1950_v51, %v1966_v46  ;;  %v1878_v1 = vrot.slane %v1864_v42, %v2687_v29  ;;  %v1896_v3 = vcombine.high %v1839_v53, %v1871_v26  ;;  %v1782_v5 = vrot.slane %v2343_v54, %v2683_v19 }
 0x184   : > { %2097 = vrot.lane.b32.xlu1 %v1895_v58, %s2571_s30  ;;  %v1991_v4 = vrot.slane %v1983_v47, %v2687_v29  ;;  %v1623_v6 = vcombine.low %v2726_v7, %v2729_v8  ;;  %v1798_v12 = vrot.slane %v2345_v48, %v2683_v19  ;;  %v1814_v2 = vrot.slane %v2347_v55, %v2683_v19  ;;  %s2480_s30 = sshll.u32 %s2579_s29, 4  ;;  %s2481_s30 = int_to_ptr.vmem [resolvable:$false] %s2480_s30 }
 0x185   : > { %2115 = vrot.lane.b32.xlu0 %v2033_v61, %s2573_s3  ;;  %v2023_v11 = vrot.slane %v2015_v60, %v2687_v29  ;;  %v1830_v13 = vrot.slane %v2349_v57, %v2683_v19  ;;  %v2034_v14 = vcombine.high %v1982_v49, %v2014_v50  ;;  %v1897_v9 = vcombine.low %v1846_v62, %v1878_v1  ;;  %p2483_p1 = scmp.lt.s32.totalorder %s2977_s23, %s2481_s30 }
 0x186   : > { %v1847_v63 = vcombine.low %v1782_v5, %v1798_v12  ;;  %v1759_v15 = vcombine.low %v2852_v37, %v2859_v45  ;;  %v1984_v16 = vcombine.high %v1918_v43, %v1934_v25  ;;  %v2016_v17 = vcombine.high %v1950_v51, %v1966_v46 }
 0x187   : > { %v2035_v10 = vcombine.low %v1991_v4, %v2023_v11  ;;  %v1879_v0 = vcombine.low %v1814_v2, %v1830_v13  ;;  %v1898_v44 = vcombine.high %v1846_v62, %v1878_v1  ;;  %v2036_v23 = vcombine.high %v1991_v4, %v2023_v11 }
 0x188   : > { %2105 = vrot.lane.b32.xlu1 %v1896_v3, %s2572_s2  ;;  %v1855_v56 = vrot.slane %v1847_v63, %v2687_v29  ;;  %v1998_v24 = vrot.slane %v1984_v16, %v2687_v29  ;;  %v2030_v27 = vrot.slane %v2016_v17, %v2687_v29  ;;  %v1848_v37 = vcombine.high %v1782_v5, %v1798_v12  ;;  %s2482_s2 = scalar_lea.vmem %s2481_s30, 512 }
 0x189   : > { %2123 = vrot.lane.b32.xlu0 %v2034_v14, %s2574_s4  ;;  %v1887_v19 = vrot.slane %v1879_v0, %v2687_v29  ;;  %v1880_v45 = vcombine.high %v1814_v2, %v1830_v13  ;;  %p2484_p3 = scmp.lt.s32.totalorder %s2482_s2, %s2476_s28 }
 0x18a   : > { %v2037_v20 = vcombine.low %v1998_v24, %v2030_v27  ;;  %v1862_v22 = vrot.slane %v1848_v37, %v2687_v29  ;;  %v2038_v31 = vcombine.high %v1998_v24, %v2030_v27 }
 0x18b   : > { %v1899_v28 = vcombine.low %v1855_v56, %v1887_v19  ;;  %v1900_v21 = vcombine.high %v1855_v56, %v1887_v19  ;;  %v1894_v30 = vrot.slane %v1880_v45, %v2687_v29  ;;  %p2485_p5 = por %p2484_p3, %p2483_p1 }
 0x18c   : > { %2113 = vrot.lane.b32.xlu1 %v1897_v9, %s2573_s3 }
 0x18d   : > { %2131 = vrot.lane.b32.xlu0 %v2035_v10, %s2575_s5  ;;  %v1901_v32 = vcombine.low %v1862_v22, %v1894_v30  ;;  %v1902_v33 = vcombine.high %v1862_v22, %v1894_v30  ;;  %p2486_p6 = pnand %p2485_p5, %p2479_p0 }
 0x190   : > { %2121 = vrot.lane.b32.xlu1 %v1898_v44, %s2574_s4 }
 0x191   : > { %2139 = vrot.lane.b32.xlu0 %v2036_v23, %s2576_s12 }
 0x194   : > { %2129 = vrot.lane.b32.xlu1 %v1899_v28, %s2575_s5 }
 0x195   : > { %2147 = vrot.lane.b32.xlu0 %v2037_v20, %s2577_s13 }
 0x198   : > { %2137 = vrot.lane.b32.xlu1 %v1900_v21, %s2576_s12 }
 0x199   : > { %2155 = vrot.lane.b32.xlu0 %v2038_v31, %s2578_s15 }
 0x19c   : > { %2145 = vrot.lane.b32.xlu1 %v1901_v32, %s2577_s13 }
 0x1a0   : > { %2153 = vrot.lane.b32.xlu1 %v1902_v33, %s2578_s15 }
 0x1c6   : > { %v2050_v34 = vpop.permute.xlu1 %2049  ;;  %v2042_v59 = vpop.permute.xlu0 %2041 }
 0x1c7   : > { %v2160_v4 = vsel %vm2159_vm0, %v1623_v6, %v2042_v59 }
 0x1c8   : > { %v2163_v12 = vsel %vm2162_vm1, %v2160_v4, %v2050_v34 }
 0x1ca   : > { %v2058_v35 = vpop.permute.xlu1 %2057 }
 0x1cb   : > { %v2166_v13 = vsel %vm2165_vm2, %v2163_v12, %v2058_v35 }
 0x1d1   : > { %v2060_v38 = vpop.permute.xlu0 %2059 }
 0x1d8   : > { %v2066_v36 = vpop.permute.xlu1 %2065 }
 0x1d9   : > { %v2169_v14 = vsel %vm2168_vm3, %v2166_v13, %v2066_v36 }
 0x1db   : > { %v2068_v53 = vpop.permute.xlu0 %2067 }
 0x1dc   : > { %v2074_v52 = vpop.permute.xlu1 %2073 }
 0x1dd   : > { %v2172_v7 = vsel %vm2171_vm4, %v2169_v14, %v2074_v52 }
 0x1df   : > { %v2076_v39 = vpop.permute.xlu0 %2075 }
 0x1e0   : > { %v2082_v18 = vpop.permute.xlu1 %2081 }
 0x1e1   : > { %v2175_v6 = vsel %vm2174_vm5, %v2172_v7, %v2082_v18 }
 0x1e3   : > { %v2084_v41 = vpop.permute.xlu0 %2083 }
 0x1e4   : > { %v2090_v40 = vpop.permute.xlu1 %2089 }
 0x1e7   : > { %v2092_v42 = vpop.permute.xlu0 %2091 }
 0x1e8   : > { %v2044_v29 = vpop.permute.xlu1 %2043 }
 0x1e9   : > { %v2161_v25 = vsel %vm2159_vm0, %v1759_v15, %v2044_v29  ;;  %v2178_v15 = vsel %vm2177_vm6, %v2175_v6, %v2090_v40 }
 0x1ec   : > { %v2052_v43 = vpop.permute.xlu1 %2051 }
 0x1ed   : > { %v2164_v26 = vsel %vm2162_vm1, %v2161_v25, %v2052_v43 }
 0x1ee   : > { %v2167_v50 = vsel %vm2165_vm2, %v2164_v26, %v2060_v38 }
 0x1ef   : > { %v2100_v49 = vpop.permute.xlu0 %2099  ;;  %v2170_v54 = vsel %vm2168_vm3, %v2167_v50, %v2068_v53 }
 0x1f0   : > { %v2173_v48 = vsel %vm2171_vm4, %v2170_v54, %v2076_v39 }
 0x1f1   : > { %v2176_v57 = vsel %vm2174_vm5, %v2173_v48, %v2084_v41 }
 0x1f2   : > { %v2179_v61 = vsel %vm2177_vm6, %v2176_v57, %v2092_v42 }
 0x1f3   : > { %v2108_v51 = vpop.permute.xlu0 %2107  ;;  %v2182_v1 = vsel %vm2180_vm7, %v2179_v61, %v2100_v49 }
 0x1f4   : > { %v2185_v11 = vsel %vm2183_vm8, %v2182_v1, %v2108_v51 }
 0x1f6   : > { %v2098_v46 = vpop.permute.xlu1 %2097 }
 0x1f7   : > { %v2116_v47 = vpop.permute.xlu0 %2115  ;;  %v2181_v17 = vsel %vm2180_vm7, %v2178_v15, %v2098_v46 }
 0x1f8   : > { %v2188_v9 = vsel %vm2186_vm9, %v2185_v11, %v2116_v47 }
 0x1fa   : > { %v2106_v55 = vpop.permute.xlu1 %2105 }
 0x1fb   : > { %v2124_v58 = vpop.permute.xlu0 %2123  ;;  %v2184_v19 = vsel %vm2183_vm8, %v2181_v17, %v2106_v55 }
 0x1fc   : > { %v2191_v8 = vsel %vm2189_vm10, %v2188_v9, %v2124_v58 }
 0x1fe   : > { %v2114_v60 = vpop.permute.xlu1 %2113 }
 0x1ff   : > { %v2132_v62 = vpop.permute.xlu0 %2131  ;;  %v2187_v24 = vsel %vm2186_vm9, %v2184_v19, %v2114_v60 }
 0x200   : > { %v2194_v63 = vsel %vm2192_vm11, %v2191_v8, %v2132_v62 }
 0x202   : > { %v2122_v3 = vpop.permute.xlu1 %2121 }
 0x203   : > { %v2140_v5 = vpop.permute.xlu0 %2139  ;;  %v2190_v28 = vsel %vm2189_vm10, %v2187_v24, %v2122_v3 }
 0x204   : > { %v2197_v16 = vsel %vm2195_vm12, %v2194_v63, %v2140_v5 }
 0x206   : > { %v2130_v2 = vpop.permute.xlu1 %2129 }
 0x207   : > { %v2148_v10 = vpop.permute.xlu0 %2147  ;;  %v2193_v37 = vsel %vm2192_vm11, %v2190_v28, %v2130_v2 }
 0x208   : > { %v2200_v44 = vsel %vm2198_vm13, %v2197_v16, %v2148_v10 }
 0x20a   : > { %v2138_v0 = vpop.permute.xlu1 %2137 }
 0x20b   : > { %v2156_v56 = vpop.permute.xlu0 %2155  ;;  %v2196_v45 = vsel %vm2195_vm12, %v2193_v37, %v2138_v0 }
 0x20c   : > { %v2203_v23 = vsel %vm2201_vm14, %v2200_v44, %v2156_v56 }
 0x20d   : > { %2206 = vst.msk [vmem:[%s164_s22 + $0x8] sm:$0xff] %vm2204_vm15, %v2203_v23 }
 0x20e   : > { %v2146_v27 = vpop.permute.xlu1 %2145 }
 0x20f   : > { %v2199_v20 = vsel %vm2198_vm13, %v2196_v45, %v2146_v27 }
 0x212   : > { %v2154_v21 = vpop.permute.xlu1 %2153 }
 0x213   : > { %v2202_v22 = vsel %vm2201_vm14, %v2199_v20, %v2154_v21 }
 0x214   : > { %2205 = vst.msk [vmem:[%s164_s22] sm:$0xff] %vm2204_vm15, %v2202_v22 }
 0x215   : > { %2489 = shalt.err (!%p2486_p6)
}
 0x216   : > { %s2490_s3 = scalar_lea.hbm %s2983_s27, 256  ;;  %s2494_s12 = scalar_lea.hbm %s3035_s1, 512 }
 0x217   : > { %p2491_p7 = scmp.ne.s32.totalorder %s2983_s27, %s2490_s3  ;;  %p2495_p13 = scmp.lt.s32.totalorder %s2983_s27, %s3035_s1 }
 0x218   : > { %p2496_p2 = scmp.lt.s32.totalorder %s2494_s12, %s2490_s3 }
 0x219   : > { %p2492_p10 = pnand %p2491_p7, %p2642_p9 }
 0x21a   : > { %p2497_p8 = por %p2496_p2, %p2495_p13 }
 0x21b   : > { %p2493_p4 = pneg %p2492_p10 }
 0x21d   : > { %p2498_p12 = pnand %p2497_p8, %p2493_p4 }
 0x21f   : > { %2501 = shalt.err (!%p2498_p12)
}
 0x220   : > { %s2580_s17 = smov 128  }
 0x221   : > { %2367 = dma.vmem_to_hbm [thread:$0]  (%p2642_p9), %s2977_s23, 256, %s2983_s27, %s2208_s9, %s2580_s17, %s2580_s17, %s2564_s18  }
 0x222 PF: > { %s2239_s22 = sand.u32 1, %s2536_s6   ;;  %p3041_p0 = scmp.ge.s32.totalorder %s2556_s11, 2 }
 0x223   : > { %s2240_s24 = scalar_lea.sflag [#allocation4], %s2239_s22 }
 0x224   : > { %p2374_p1 = pnand %p3041_p0, %p2649_p11 }
 0x226   : > { %p2375_p3 = pneg %p2374_p1 }
 0x228   : > { %2531 = dma.done.wait (%p2375_p3), %s2240_s24, 256  }
 0x229   : > { %2533 = vsyncadd (%p2375_p3), %s2240_s24, 4294967040  ;;  %s17_s11 = sadd.s32 1, %s2556_s11   ;;  %s3042_s6 = smov %s2540_s7 }
 0x22a   : > { %p14_p5 = scmp.ge.s32.totalorder %s17_s11, 4   ;;  %s3043_s7 = smov %s2544_s8 }
 0x22b   : > { %s3044_s8 = smov %s2647_s20  ;;  %s3045_s9 = smov %s2552_s10 }
 0x22c   : > { %s3046_s10 = smov %s3048_s14  ;;  %16 = sbr.rel (!%p14_p5) target bundleno = 6 (0x6), region = 69 }
 0x231   :  { %2245 = vsyncpa [#allocation3], 1 }
 0x232   :  { %2247 = vsyncpa [#allocation3 + $0x1], 1 }
 0x233   :  { %2248 = vsyncpa [#allocation4], 1 }
 0x234   :  { %2250 = vsyncpa [#allocation4 + $0x1], 1 }

// kernel: tpu_custom_call.1
= control target key start
LH: loop header
LB: loop body
LE: loop exit
PB: predicated region body
PF: predicated region fallthrough
CT: control target
= control target key end

     0   :  { %6 = vsyncpa [#allocation3], 0  ;;  %s2137_s0 = inlined_call_operand.hbm [shape: f32[2,4,16,16], index: 0, kind: input, shape index: {}]   ;;  %s2138_s1 = inlined_call_operand.vmem [shape: f32[2,16,16,4], index: 1, kind: output, shape index: {}]  }
   0x1   :  { %8 = vsyncpa [#allocation3 + $0x1], 0  ;;  %s1874_s6 = smov 0   ;;  %s1876_s7 = smov 0  }
   0x2   :  { %s1878_s8 = smov 0   ;;  %s1880_s9 = smov 0  }
   0x3   :  { %s1882_s10 = smov 0   ;;  %s1884_s11 = smov 0  }
   0x4 LB: > { %s1703_s12 = sadd.s32 4294967295, %s1856_s11   ;;  %s40_s13 = sadd.s32 1, %s1852_s10  ;;  %s1856_s11 = sphi %s1884_s11, %s14_s11   ;;  %s1852_s10 = sphi %s1882_s10, %s2146_s10   ;;  %s1848_s9 = sphi %s1880_s9, %s2145_s9   ;;  %s1844_s8 = sphi %s1878_s8, %s2144_s8   ;;  %s1840_s7 = sphi %s1876_s7, %s2143_s7   ;;  %s1836_s6 = sphi %s1874_s6, %s2142_s6  }
   0x5   : > { %p42_p0 = scmp.ge.s32.totalorder %s40_s13, 2  ;;  %s53_s14 = sadd.s32 1, %s1844_s8 }
   0x6   : > { %p60_p1 = scmp.ne.s32.totalorder %s1844_s8, %s1840_s7  ;;  %p61_p2 = scmp.eq.s32.totalorder %s1856_s11, 0 }
   0x7   : > { %s2148_s13 = smov (%p42_p0, %s40_s13), 0  ;;  %p66_p4 = scmp.ne.s32.totalorder %s1840_s7, %s1836_s6 }
   0x8   : > { %p1910_p3 = por %p61_p2, %p60_p1  ;;  %s44_s16 = ssub.s32 %s1852_s10, %s2148_s13 }
   0x9   : > { %p67_p5 = scmp.eq.s32.totalorder %s1703_s12, 0  ;;  %p51_p6 = scmp.eq.s32.totalorder %s44_s16, 0 }
   0xa   : > { %p1724_p8 = scmp.lt.s32.totalorder %s1856_s11, 2  ;;  %s122_s19 = sand.u32 1, %s1844_s8  }
   0xb   : > { %p1917_p7 = por %p67_p5, %p66_p4  ;;  %s1716_s20 = sshll.u32 %s1852_s10, 10 }
   0xc   : > { %s1923_s18 = scalar_select %p51_p6, %s1844_s8, %s53_s14  }
   0xd   : > { %s1707_s21 = sshll.u32 %s122_s19, 6  ;;  %s138_s24 = scalar_lea.hbm %s2137_s0, %s1716_s20 }
   0xe   : > { %s126_s25 = scalar_lea.vmem [#allocation2], %s1707_s21  ;;  %p1932_p9 = pnand %p1724_p8, %p1910_p3 }
   0xf   : > { %s139_s26 = sshll.u32 %s126_s25, 4  ;;  %s123_s28 = scalar_lea.sflag [#allocation3], %s122_s19  ;;  %s140_s26 = int_to_ptr.vmem [resolvable:$true] %s139_s26 }
  0x10   : > { %p1780_p10 = pneg %p1932_p9  ;;  %s1791_s29 = scalar_lea.vmem %s140_s26, 1024 }
  0x11   : > { %p1792_p11 = scmp.ne.s32.totalorder %s140_s26, %s1791_s29  ;;  %s1858_s30 = smov [#allocation2]  }
  0x12   : > { %s1796_s2 = sshll.u32 %s1858_s30, 4  ;;  %s1797_s2 = int_to_ptr.vmem [resolvable:$false] %s1796_s2 }
  0x13   : > { %p1794_p12 = pnand %p1792_p11, %p1780_p10  ;;  %s1798_s3 = scalar_lea.vmem %s1797_s2, 2048 }
  0x14   : > { %p1799_p0 = scmp.lt.s32.totalorder %s140_s26, %s1797_s2  ;;  %p1800_p1 = scmp.lt.s32.totalorder %s1798_s3, %s1791_s29 }
  0x15   : > { %p1795_p13 = pneg %p1794_p12 }
  0x16   : > { %p1801_p2 = por %p1800_p1, %p1799_p0 }
  0x18   : > { %p1802_p3 = pnand %p1801_p2, %p1795_p13 }
  0x1a   : > { %1805 = shalt.err (!%p1802_p3)
}
  0x1b   : > { %s1859_s4 = smov 128   ;;  %s1860_s5 = smov 8  }
  0x1c   : > { %1723 = dma.hbm_to_vmem [thread:$0]  (!%p1932_p9), %s138_s24, 1024, %s140_s26, %s123_s28, %s1859_s4, %s1859_s4, %s1860_s5  }
  0x1d   : > { %p1710_p4 = scmp.ge.s32.totalorder %s1856_s11, 1  ;;  %p147_p5 = scmp.lt.s32.totalorder %s1856_s11, 3 }
  0x1f   : > { %p148_p6 = pnand %p1710_p4, %p147_p5 }
  0x20   : > { %s153_s6 = sand.u32 (!%p148_p6), 1, %s1840_s7  }
  0x21   : > { %151 = sbr.rel (%p148_p6) target bundleno = 384 (0x180), region = 24  ;;  %s1711_s12 = sshll.u32 (!%p148_p6), %s153_s6, 6 }
  0x22   : > { %s154_s14 = scalar_lea.sflag (!%p148_p6), [#allocation3], %s153_s6  ;;  %s157_s15 = scalar_lea.vmem (!%p148_p6), [#allocation2], %s1711_s12 }
  0x26   : > { %1831 = dma.done.wait (%p1917_p7), %s154_s14, 1024  }
  0x27   : > { %1833 = vsyncadd (%p1917_p7), %s154_s14, 4294966272  ;;  %v211_v0 = vld [vmem:[%s157_s15 + $0x10] sm:$0xff]  ;;  %v209_v1 = vld [vmem:[%s157_s15] sm:$0xff]  ;;  %v1861_v8 = vmov 1983009808   ;;  %v350_v10 = vlaneseq  ;;  %v1863_v35 = vmov 0.0  }
  0x28   : > { %249 = vxpose.xlu1.b32.start [1/2] (short) (narrow) %v211_v0, 16  ;;  %217 = vxpose.xlu0.b32.start [1/2] (short) (narrow) %v209_v1, 16  ;;  %v212_v2 = vld [vmem:[%s157_s15 + $0x18] sm:$0xff]  ;;  %v210_v3 = vld [vmem:[%s157_s15 + $0x8] sm:$0xff]  ;;  %v215_v4 = vld [vmem:[%s157_s15 + $0x30] sm:$0xff]  ;;  %v348_v9 = vunpack.c.l.s4 %v1861_v8  ;;  %p192_p7 = scmp.lt.s32.totalorder %s1848_s9, 1 }
  0x29   : > { %v213_v5 = vld [vmem:[%s157_s15 + $0x20] sm:$0xff]  ;;  %v216_v6 = vld [vmem:[%s157_s15 + $0x38] sm:$0xff]  ;;  %v214_v7 = vld [vmem:[%s157_s15 + $0x28] sm:$0xff]  ;;  %v351_v14 = vshrl.u32 %v350_v10, 7  ;;  %v1862_v17 = vmov 1934713408  }
  0x2a   : > { %v349_v13 = vunpack.c.0.s8 %v348_v9  ;;  %v380_v18 = vunpack.c.l.s4 %v1862_v17  ;;  %vm1537_vm0 = vcmask 31744   ;;  %s2150_s9 = smov (!%p192_p7, %s1848_s9), 1 }
  0x2b   : > { %s1717_s16 = sshll.u32 %s2150_s9, 8 }
  0x2c   : > { %250 = vxpose.xlu1.b32.end [2/2] (short) (narrow) %v212_v2, 16  ;;  %218 = vxpose.xlu0.b32.end [2/2] (short) (narrow) %v210_v3, 16  ;;  %v1947_v19 = vsub.s32 %v349_v13, %v351_v14  ;;  %v381_v22 = vunpack.c.0.s8 %v380_v18  ;;  %s2003_s19 = scalar_lea.vmem %s2138_s1, %s1717_s16 }
  0x2e   : > { %v1951_v29 = vsub.s32 %v381_v22, %v351_v14 }
  0x30   : > { %313 = vxpose.xlu1.b32.start [1/2] (short) (narrow) %v215_v4, 16  ;;  %281 = vxpose.xlu0.b32.start [1/2] (short) (narrow) %v213_v5, 16 }
  0x34   : > { %314 = vxpose.xlu1.b32.end [2/2] (short) (narrow) %v216_v6, 16  ;;  %282 = vxpose.xlu0.b32.end [2/2] (short) (narrow) %v214_v7, 16 }
  0xa4   : > { %v265_v11 = vpop.trf.xlu1  ;;  %v233_v12 = vpop.trf.xlu0 }
  0xa8   : > { %v266_v15 = vpop.trf.xlu1  ;;  %v234_v16 = vpop.trf.xlu0 }
  0xac   : > { %v329_v20 = vpop.trf.xlu1  ;;  %v297_v21 = vpop.trf.xlu0 }
  0xad   : > { %v361_v23 = vcombine.low %v265_v11, %v329_v20  ;;  %v345_v24 = vcombine.low %v233_v12, %v297_v21  ;;  %v362_v27 = vcombine.high %v265_v11, %v329_v20  ;;  %v346_v28 = vcombine.high %v233_v12, %v297_v21 }
  0xaf   : > { %v369_v25 = vrot.slane %v361_v23, %v1947_v19  ;;  %v353_v26 = vrot.slane %v345_v24, %v1947_v19  ;;  %v376_v32 = vrot.slane %v362_v27, %v1947_v19  ;;  %v360_v33 = vrot.slane %v346_v28, %v1947_v19 }
  0xb0   : > { %v330_v37 = vpop.trf.xlu1  ;;  %v298_v38 = vpop.trf.xlu0 }
  0xb1   : > { %v377_v30 = vcombine.low %v353_v26, %v369_v25  ;;  %v378_v31 = vcombine.high %v353_v26, %v369_v25  ;;  %v393_v40 = vcombine.low %v360_v33, %v376_v32  ;;  %v429_v41 = vcombine.low %v266_v15, %v330_v37 }
  0xb2   : > { %v413_v42 = vcombine.low %v234_v16, %v298_v38  ;;  %v394_v45 = vcombine.high %v360_v33, %v376_v32  ;;  %v430_v51 = vcombine.high %v266_v15, %v330_v37  ;;  %v414_v52 = vcombine.high %v234_v16, %v298_v38 }
  0xb3   : > { %v385_v34 = vrot.slane %v377_v30, %v1951_v29  ;;  %v392_v39 = vrot.slane %v378_v31, %v1951_v29  ;;  %v401_v44 = vrot.slane %v393_v40, %v1951_v29  ;;  %v437_v46 = vrot.slane %v429_v41, %v1947_v19 }
  0xb4   : > { %v421_v47 = vrot.slane %v413_v42, %v1947_v19  ;;  %v408_v49 = vrot.slane %v394_v45, %v1951_v29  ;;  %v444_v56 = vrot.slane %v430_v51, %v1947_v19  ;;  %v428_v57 = vrot.slane %v414_v52, %v1947_v19 }
  0xb5   : > { %481 = vxpose.xlu0.b32.start.end [1/1] (short) (narrow) %v385_v34, 16  ;;  %v409_v36 = vcombine.high %v385_v34, %v1863_v35  ;;  %v410_v43 = vcombine.high %v392_v39, %v1863_v35  ;;  %v411_v48 = vcombine.high %v401_v44, %v1863_v35 }
  0xb6   : > { %v445_v50 = vcombine.low %v421_v47, %v437_v46  ;;  %v412_v53 = vcombine.high %v408_v49, %v1863_v35  ;;  %v446_v55 = vcombine.high %v421_v47, %v437_v46  ;;  %v461_v60 = vcombine.low %v428_v57, %v444_v56 }
  0xb7   : > { %513 = vxpose.xlu1.b32.start.end [1/1] (short) (narrow) %v409_v36, 16  ;;  %v462_v63 = vcombine.high %v428_v57, %v444_v56 }
  0xb8   : > { %v453_v54 = vrot.slane %v445_v50, %v1951_v29  ;;  %v460_v59 = vrot.slane %v446_v55, %v1951_v29  ;;  %v469_v62 = vrot.slane %v461_v60, %v1951_v29 }
  0xb9   : > { %v476_v1 = vrot.slane %v462_v63, %v1951_v29 }
  0xba   : > { %545 = vxpose.xlu0.b32.start.end [1/1] (short) (narrow) %v392_v39, 16  ;;  %v477_v58 = vcombine.high %v453_v54, %v1863_v35  ;;  %v478_v61 = vcombine.high %v460_v59, %v1863_v35  ;;  %v479_v0 = vcombine.high %v469_v62, %v1863_v35 }
  0xbb   : > { %v480_v2 = vcombine.high %v476_v1, %v1863_v35 }
  0xbc   : > { %577 = vxpose.xlu1.b32.start.end [1/1] (short) (narrow) %v410_v43, 16 }
  0xbf   : > { %609 = vxpose.xlu0.b32.start.end [1/1] (short) (narrow) %v401_v44, 16 }
  0xc1   : > { %641 = vxpose.xlu1.b32.start.end [1/1] (short) (narrow) %v411_v48, 16 }
  0xc4   : > { %673 = vxpose.xlu0.b32.start.end [1/1] (short) (narrow) %v408_v49, 16 }
  0xc6   : > { %705 = vxpose.xlu1.b32.start.end [1/1] (short) (narrow) %v412_v53, 16 }
  0xc9   : > { %737 = vxpose.xlu0.b32.start.end [1/1] (short) (narrow) %v453_v54, 16 }
  0xcb   : > { %769 = vxpose.xlu1.b32.start.end [1/1] (short) (narrow) %v477_v58, 16 }
  0xce   : > { %801 = vxpose.xlu0.b32.start.end [1/1] (short) (narrow) %v460_v59, 16 }
  0xd0   : > { %833 = vxpose.xlu1.b32.start.end [1/1] (short) (narrow) %v478_v61, 16 }
  0xd3   : > { %865 = vxpose.xlu0.b32.start.end [1/1] (short) (narrow) %v469_v62, 16 }
  0xd5   : > { %897 = vxpose.xlu1.b32.start.end [1/1] (short) (narrow) %v479_v0, 16 }
  0xd8   : > { %929 = vxpose.xlu0.b32.start.end [1/1] (short) (narrow) %v476_v1, 16 }
  0xda   : > { %961 = vxpose.xlu1.b32.start.end [1/1] (short) (narrow) %v480_v2, 16 }
 0x131   : > { %v497_v3 = vpop.trf.xlu0 }
 0x133   : > { %v529_v4 = vpop.trf.xlu1 }
 0x135   : > { %v498_v5 = vpop.trf.xlu0 }
 0x137   : > { %v530_v6 = vpop.trf.xlu1 }
 0x139   : > { %v561_v7 = vpop.trf.xlu0 }
 0x13a   : > { %v993_v14 = vcombine.low %v497_v3, %v561_v7  ;;  %v994_v15 = vcombine.high %v497_v3, %v561_v7 }
 0x13b   : > { %v593_v8 = vpop.trf.xlu1 }
 0x13c   : > { %v1009_v11 = vcombine.low %v529_v4, %v593_v8  ;;  %v1010_v12 = vcombine.high %v529_v4, %v593_v8  ;;  %v1001_v21 = vrot.slane %v993_v14, %v1947_v19  ;;  %v1008_v22 = vrot.slane %v994_v15, %v1947_v19 }
 0x13d   : > { %v562_v9 = vpop.trf.xlu0 }
 0x13e   : > { %v1017_v17 = vrot.slane %v1009_v11, %v1947_v19  ;;  %v1024_v18 = vrot.slane %v1010_v12, %v1947_v19  ;;  %v1265_v23 = vcombine.low %v498_v5, %v562_v9  ;;  %v1266_v27 = vcombine.high %v498_v5, %v562_v9 }
 0x13f   : > { %v594_v10 = vpop.trf.xlu1 }
 0x140   : > { %v1281_v24 = vcombine.low %v530_v6, %v594_v10  ;;  %v1057_v26 = vcombine.low %v1001_v21, %v1017_v17  ;;  %v1058_v28 = vcombine.high %v1001_v21, %v1017_v17  ;;  %v1073_v30 = vcombine.low %v1008_v22, %v1024_v18 }
 0x141   : > { %v625_v13 = vpop.trf.xlu0  ;;  %v1074_v31 = vcombine.high %v1008_v22, %v1024_v18  ;;  %v1282_v32 = vcombine.high %v530_v6, %v594_v10  ;;  %v1273_v36 = vrot.slane %v1265_v23, %v1947_v19  ;;  %v1976_v40 = vrot.slane %v1266_v27, %v1947_v19 }
 0x142   : > { %v1289_v37 = vrot.slane %v1281_v24, %v1947_v19  ;;  %v1065_v39 = vrot.slane %v1057_v26, %v1951_v29  ;;  %v1072_v43 = vrot.slane %v1058_v28, %v1951_v29  ;;  %v1081_v44 = vrot.slane %v1073_v30, %v1951_v29 }
 0x143   : > { %v657_v16 = vpop.trf.xlu1  ;;  %v1088_v45 = vrot.slane %v1074_v31, %v1951_v29  ;;  %v1296_v46 = vrot.slane %v1282_v32, %v1947_v19 }
 0x144   : > { %v1329_v52 = vcombine.low %v1273_v36, %v1289_v37  ;;  %v1330_v53 = vcombine.high %v1273_v36, %v1289_v37 }
 0x145   : > { %v626_v20 = vpop.trf.xlu0  ;;  %v1345_v61 = vcombine.low %v1976_v40, %v1296_v46  ;;  %v1346_v62 = vcombine.high %v1976_v40, %v1296_v46 }
 0x146   : > { %v1344_v26 = vrot.slane %v1330_v53, %v1951_v29 }
 0x147   : > { %v658_v25 = vpop.trf.xlu1 }
 0x149   : > { %v689_v33 = vpop.trf.xlu0 }
 0x14a   : > { %v1025_v34 = vcombine.low %v625_v13, %v689_v33  ;;  %v1026_v35 = vcombine.high %v625_v13, %v689_v33  ;;  %v1353_v33 = vrot.slane %v1345_v61, %v1951_v29 }
 0x14b   : > { %v721_v38 = vpop.trf.xlu1 }
 0x14c   : > { %v1041_v41 = vcombine.low %v657_v16, %v721_v38  ;;  %v1042_v42 = vcombine.high %v657_v16, %v721_v38  ;;  %v1033_v48 = vrot.slane %v1025_v34, %v1947_v19  ;;  %v1040_v49 = vrot.slane %v1026_v35, %v1947_v19 }
 0x14d   : > { %v690_v47 = vpop.trf.xlu0  ;;  %v1360_v34 = vrot.slane %v1346_v62, %v1951_v29 }
 0x14e   : > { %v1049_v50 = vrot.slane %v1041_v41, %v1947_v19  ;;  %v1056_v51 = vrot.slane %v1042_v42, %v1947_v19  ;;  %v1297_v54 = vcombine.low %v626_v20, %v690_v47  ;;  %v1298_v55 = vcombine.high %v626_v20, %v690_v47 }
 0x14f   : > { %v722_v56 = vpop.trf.xlu1 }
 0x150   : > { %v1089_v57 = vcombine.low %v1033_v48, %v1049_v50  ;;  %v1090_v58 = vcombine.high %v1033_v48, %v1049_v50  ;;  %v1105_v59 = vcombine.low %v1040_v49, %v1056_v51  ;;  %v1106_v60 = vcombine.high %v1040_v49, %v1056_v51 }
 0x151   : > { %v1313_v63 = vcombine.low %v658_v25, %v722_v56  ;;  %v1314_v0 = vcombine.high %v658_v25, %v722_v56  ;;  %v1994_v1 = vpop.trf.xlu0  ;;  %v1305_v6 = vrot.slane %v1297_v54, %v1947_v19  ;;  %v1312_v7 = vrot.slane %v1298_v55, %v1947_v19 }
 0x152   : > { %v1097_v2 = vrot.slane %v1089_v57, %v1951_v29  ;;  %v1104_v3 = vrot.slane %v1090_v58, %v1951_v29  ;;  %v1113_v4 = vrot.slane %v1105_v59, %v1951_v29  ;;  %v1120_v5 = vrot.slane %v1106_v60, %v1951_v29 }
 0x153   : > { %v1321_v8 = vrot.slane %v1313_v63, %v1947_v19  ;;  %v1328_v9 = vrot.slane %v1314_v0, %v1947_v19  ;;  %v785_v10 = vpop.trf.xlu1  ;;  %v1337_v25 = vrot.slane %v1329_v52, %v1951_v29 }
 0x154   : > { %v1121_v11 = vcombine.low %v1065_v39, %v1097_v2  ;;  %v1122_v12 = vcombine.high %v1065_v39, %v1097_v2  ;;  %v1123_v13 = vcombine.low %v1072_v43, %v1104_v3  ;;  %v1124_v14 = vcombine.high %v1072_v43, %v1104_v3 }
 0x155   : > { %v1125_v15 = vcombine.low %v1081_v44, %v1113_v4  ;;  %v1126_v16 = vcombine.high %v1081_v44, %v1113_v4  ;;  %v1127_v17 = vcombine.low %v1088_v45, %v1120_v5  ;;  %v1128_v18 = vcombine.high %v1088_v45, %v1120_v5  ;;  %v2009_v20 = vpop.trf.xlu0 }
 0x156   : > { %1538 = vst.msk [vmem:[%s2003_s19] sm:$0xff] %vm1537_vm0, %v1121_v11  ;;  %1540 = vst.msk [vmem:[%s2003_s19 + $0x10] sm:$0xff] %vm1537_vm0, %v1122_v12  ;;  %v1361_v21 = vcombine.low %v1305_v6, %v1321_v8  ;;  %v1362_v22 = vcombine.high %v1305_v6, %v1321_v8  ;;  %v1377_v23 = vcombine.low %v1312_v7, %v1328_v9 }
 0x157   : > { %1542 = vst.msk [vmem:[%s2003_s19 + $0x20] sm:$0xff] %vm1537_vm0, %v1123_v13  ;;  %1544 = vst.msk [vmem:[%s2003_s19 + $0x30] sm:$0xff] %vm1537_vm0, %v1124_v14  ;;  %v1378_v24 = vcombine.high %v1312_v7, %v1328_v9  ;;  %v786_v27 = vpop.trf.xlu1 }
 0x158   : > { %1546 = vst.msk [vmem:[%s2003_s19 + $0x40] sm:$0xff] %vm1537_vm0, %v1125_v15  ;;  %1548 = vst.msk [vmem:[%s2003_s19 + $0x50] sm:$0xff] %vm1537_vm0, %v1126_v16  ;;  %v1369_v28 = vrot.slane %v1361_v21, %v1951_v29  ;;  %v1376_v30 = vrot.slane %v1362_v22, %v1951_v29  ;;  %v1385_v31 = vrot.slane %v1377_v23, %v1951_v29 }
 0x159   : > { %1550 = vst.msk [vmem:[%s2003_s19 + $0x60] sm:$0xff] %vm1537_vm0, %v1127_v17  ;;  %1552 = vst.msk [vmem:[%s2003_s19 + $0x70] sm:$0xff] %vm1537_vm0, %v1128_v18  ;;  %v1392_v32 = vrot.slane %v1378_v24, %v1951_v29  ;;  %v817_v35 = vpop.trf.xlu0 }
 0x15a   : > { %v1393_v36 = vcombine.low %v1337_v25, %v1369_v28  ;;  %v1394_v37 = vcombine.high %v1337_v25, %v1369_v28  ;;  %v1395_v38 = vcombine.low %v1344_v26, %v1376_v30  ;;  %v1396_v39 = vcombine.high %v1344_v26, %v1376_v30 }
 0x15b   : > { %v1397_v40 = vcombine.low %v1353_v33, %v1385_v31  ;;  %v1398_v41 = vcombine.high %v1353_v33, %v1385_v31  ;;  %v1399_v42 = vcombine.low %v1360_v34, %v1392_v32  ;;  %v1400_v43 = vcombine.high %v1360_v34, %v1392_v32  ;;  %v849_v44 = vpop.trf.xlu1 }
 0x15c   : > { %1554 = vst.msk [vmem:[%s2003_s19 + $0x80] sm:$0xff] %vm1537_vm0, %v1393_v36  ;;  %1556 = vst.msk [vmem:[%s2003_s19 + $0x90] sm:$0xff] %vm1537_vm0, %v1394_v37  ;;  %v1145_v47 = vcombine.low %v785_v10, %v849_v44  ;;  %v1146_v48 = vcombine.high %v785_v10, %v849_v44  ;;  %v1129_v50 = vcombine.low %v1994_v1, %v817_v35 }
 0x15d   : > { %1558 = vst.msk [vmem:[%s2003_s19 + $0xa0] sm:$0xff] %vm1537_vm0, %v1395_v38  ;;  %1560 = vst.msk [vmem:[%s2003_s19 + $0xb0] sm:$0xff] %vm1537_vm0, %v1396_v39  ;;  %v818_v45 = vpop.trf.xlu0  ;;  %v1130_v51 = vcombine.high %v1994_v1, %v817_v35 }
 0x15e   : > { %1562 = vst.msk [vmem:[%s2003_s19 + $0xc0] sm:$0xff] %vm1537_vm0, %v1397_v40  ;;  %1564 = vst.msk [vmem:[%s2003_s19 + $0xd0] sm:$0xff] %vm1537_vm0, %v1398_v41  ;;  %v1153_v53 = vrot.slane %v1145_v47, %v1947_v19  ;;  %v1160_v54 = vrot.slane %v1146_v48, %v1947_v19  ;;  %v1137_v56 = vrot.slane %v1129_v50, %v1947_v19 }
 0x15f   : > { %1566 = vst.msk [vmem:[%s2003_s19 + $0xe0] sm:$0xff] %vm1537_vm0, %v1399_v42  ;;  %1568 = vst.msk [vmem:[%s2003_s19 + $0xf0] sm:$0xff] %vm1537_vm0, %v1400_v43  ;;  %v850_v46 = vpop.trf.xlu1  ;;  %v1144_v57 = vrot.slane %v1130_v51, %v1947_v19  ;;  %v1401_v58 = vcombine.low %v2009_v20, %v818_v45  ;;  %v1402_v62 = vcombine.high %v2009_v20, %v818_v45 }
 0x160   : > { %v1417_v59 = vcombine.low %v786_v27, %v850_v46  ;;  %v1193_v61 = vcombine.low %v1137_v56, %v1153_v53  ;;  %v1194_v63 = vcombine.high %v1137_v56, %v1153_v53  ;;  %v1418_v2 = vcombine.high %v786_v27, %v850_v46 }
 0x161   : > { %v881_v49 = vpop.trf.xlu0  ;;  %v1209_v0 = vcombine.low %v1144_v57, %v1160_v54  ;;  %v1210_v1 = vcombine.high %v1144_v57, %v1160_v54  ;;  %v1409_v6 = vrot.slane %v1401_v58, %v1947_v19  ;;  %v1416_v10 = vrot.slane %v1402_v62, %v1947_v19 }
 0x162   : > { %v1425_v7 = vrot.slane %v1417_v59, %v1947_v19  ;;  %v1201_v9 = vrot.slane %v1193_v61, %v1951_v29  ;;  %v1208_v13 = vrot.slane %v1194_v63, %v1951_v29  ;;  %v1432_v16 = vrot.slane %v1418_v2, %v1947_v19 }
 0x163   : > { %v913_v52 = vpop.trf.xlu1  ;;  %v1217_v14 = vrot.slane %v1209_v0, %v1951_v29  ;;  %v1224_v15 = vrot.slane %v1210_v1, %v1951_v29 }
 0x164   : > { %v1465_v23 = vcombine.low %v1409_v6, %v1425_v7  ;;  %v1466_v24 = vcombine.high %v1409_v6, %v1425_v7  ;;  %v1481_v33 = vcombine.low %v1416_v10, %v1432_v16  ;;  %v1482_v34 = vcombine.high %v1416_v10, %v1432_v16 }
 0x165   : > { %v882_v55 = vpop.trf.xlu0 }
 0x166   : > { %v1473_v56 = vrot.slane %v1465_v23, %v1951_v29  ;;  %v1480_v57 = vrot.slane %v1466_v24, %v1951_v29  ;;  %v1489_v62 = vrot.slane %v1481_v33, %v1951_v29  ;;  %v1496_v63 = vrot.slane %v1482_v34, %v1951_v29 }
 0x167   : > { %v914_v60 = vpop.trf.xlu1 }
 0x169   : > { %v945_v3 = vpop.trf.xlu0 }
 0x16a   : > { %v1161_v4 = vcombine.low %v881_v49, %v945_v3  ;;  %v1162_v5 = vcombine.high %v881_v49, %v945_v3 }
 0x16b   : > { %v977_v8 = vpop.trf.xlu1 }
 0x16c   : > { %v1177_v11 = vcombine.low %v913_v52, %v977_v8  ;;  %v1178_v12 = vcombine.high %v913_v52, %v977_v8  ;;  %v1169_v18 = vrot.slane %v1161_v4, %v1947_v19  ;;  %v1176_v20 = vrot.slane %v1162_v5, %v1947_v19 }
 0x16d   : > { %v946_v17 = vpop.trf.xlu0 }
 0x16e   : > { %v1185_v21 = vrot.slane %v1177_v11, %v1947_v19  ;;  %v1192_v22 = vrot.slane %v1178_v12, %v1947_v19  ;;  %v1433_v25 = vcombine.low %v882_v55, %v946_v17  ;;  %v1434_v26 = vcombine.high %v882_v55, %v946_v17 }
 0x16f   : > { %v978_v27 = vpop.trf.xlu1 }
 0x170   : > { %v1225_v28 = vcombine.low %v1169_v18, %v1185_v21  ;;  %v1226_v30 = vcombine.high %v1169_v18, %v1185_v21  ;;  %v1241_v31 = vcombine.low %v1176_v20, %v1192_v22  ;;  %v1242_v32 = vcombine.high %v1176_v20, %v1192_v22 }
 0x171   : > { %v1449_v35 = vcombine.low %v914_v60, %v978_v27  ;;  %v1450_v36 = vcombine.high %v914_v60, %v978_v27  ;;  %v1441_v41 = vrot.slane %v1433_v25, %v1947_v19  ;;  %v1448_v42 = vrot.slane %v1434_v26, %v1947_v19 }
 0x172   : > { %v1233_v37 = vrot.slane %v1225_v28, %v1951_v29  ;;  %v1240_v38 = vrot.slane %v1226_v30, %v1951_v29  ;;  %v1249_v39 = vrot.slane %v1241_v31, %v1951_v29  ;;  %v1256_v40 = vrot.slane %v1242_v32, %v1951_v29 }
 0x173   : > { %v1457_v43 = vrot.slane %v1449_v35, %v1947_v19  ;;  %v1464_v44 = vrot.slane %v1450_v36, %v1947_v19 }
 0x174   : > { %v1257_v45 = vcombine.low %v1201_v9, %v1233_v37  ;;  %v1258_v46 = vcombine.high %v1201_v9, %v1233_v37  ;;  %v1259_v47 = vcombine.low %v1208_v13, %v1240_v38  ;;  %v1260_v48 = vcombine.high %v1208_v13, %v1240_v38 }
 0x175   : > { %v1261_v49 = vcombine.low %v1217_v14, %v1249_v39  ;;  %v1262_v50 = vcombine.high %v1217_v14, %v1249_v39  ;;  %v1263_v51 = vcombine.low %v1224_v15, %v1256_v40  ;;  %v1264_v52 = vcombine.high %v1224_v15, %v1256_v40 }
 0x176   : > { %1539 = vst.msk [vmem:[%s2003_s19 + $0x8] sm:$0xff] %vm1537_vm0, %v1257_v45  ;;  %1541 = vst.msk [vmem:[%s2003_s19 + $0x18] sm:$0xff] %vm1537_vm0, %v1258_v46  ;;  %v1497_v19 = vcombine.low %v1441_v41, %v1457_v43  ;;  %v1498_v53 = vcombine.high %v1441_v41, %v1457_v43  ;;  %v1513_v54 = vcombine.low %v1448_v42, %v1464_v44 }
 0x177   : > { %1543 = vst.msk [vmem:[%s2003_s19 + $0x28] sm:$0xff] %vm1537_vm0, %v1259_v47  ;;  %1545 = vst.msk [vmem:[%s2003_s19 + $0x38] sm:$0xff] %vm1537_vm0, %v1260_v48  ;;  %v1514_v55 = vcombine.high %v1448_v42, %v1464_v44 }
 0x178   : > { %1547 = vst.msk [vmem:[%s2003_s19 + $0x48] sm:$0xff] %vm1537_vm0, %v1261_v49  ;;  %1549 = vst.msk [vmem:[%s2003_s19 + $0x58] sm:$0xff] %vm1537_vm0, %v1262_v50  ;;  %v1505_v58 = vrot.slane %v1497_v19, %v1951_v29  ;;  %v1512_v59 = vrot.slane %v1498_v53, %v1951_v29  ;;  %v1521_v60 = vrot.slane %v1513_v54, %v1951_v29 }
 0x179   : > { %1551 = vst.msk [vmem:[%s2003_s19 + $0x68] sm:$0xff] %vm1537_vm0, %v1263_v51  ;;  %1553 = vst.msk [vmem:[%s2003_s19 + $0x78] sm:$0xff] %vm1537_vm0, %v1264_v52  ;;  %v1528_v61 = vrot.slane %v1514_v55, %v1951_v29 }
 0x17a   : > { %v1529_v0 = vcombine.low %v1473_v56, %v1505_v58  ;;  %v1530_v1 = vcombine.high %v1473_v56, %v1505_v58  ;;  %v1531_v2 = vcombine.low %v1480_v57, %v1512_v59  ;;  %v1532_v3 = vcombine.high %v1480_v57, %v1512_v59 }
 0x17b   : > { %v1533_v4 = vcombine.low %v1489_v62, %v1521_v60  ;;  %v1534_v5 = vcombine.high %v1489_v62, %v1521_v60  ;;  %v1535_v6 = vcombine.low %v1496_v63, %v1528_v61  ;;  %v1536_v7 = vcombine.high %v1496_v63, %v1528_v61 }
 0x17c   : > { %1555 = vst.msk [vmem:[%s2003_s19 + $0x88] sm:$0xff] %vm1537_vm0, %v1529_v0  ;;  %1557 = vst.msk [vmem:[%s2003_s19 + $0x98] sm:$0xff] %vm1537_vm0, %v1530_v1 }
 0x17d   : > { %1559 = vst.msk [vmem:[%s2003_s19 + $0xa8] sm:$0xff] %vm1537_vm0, %v1531_v2  ;;  %1561 = vst.msk [vmem:[%s2003_s19 + $0xb8] sm:$0xff] %vm1537_vm0, %v1532_v3 }
 0x17e   : > { %1563 = vst.msk [vmem:[%s2003_s19 + $0xc8] sm:$0xff] %vm1537_vm0, %v1533_v4  ;;  %1565 = vst.msk [vmem:[%s2003_s19 + $0xd8] sm:$0xff] %vm1537_vm0, %v1534_v5 }
 0x17f   : > { %1567 = vst.msk [vmem:[%s2003_s19 + $0xe8] sm:$0xff] %vm1537_vm0, %v1535_v6  ;;  %1569 = vst.msk [vmem:[%s2003_s19 + $0xf8] sm:$0xff] %vm1537_vm0, %v1536_v7 }
 0x180 PF: > { %s14_s11 = sadd.s32 1, %s1856_s11   ;;  %s2142_s6 = smov %s1840_s7 }
 0x181   : > { %p11_p8 = scmp.ge.s32.totalorder %s14_s11, 4   ;;  %s2143_s7 = smov %s1844_s8 }
 0x182   : > { %s2144_s8 = smov %s1923_s18  ;;  %s2145_s9 = smov %s1852_s10 }
 0x183   : > { %s2146_s10 = smov %s2148_s13  ;;  %13 = sbr.rel (!%p11_p8) target bundleno = 4 (0x4), region = 64 }
 0x188   :  { %1617 = vsyncpa [#allocation3], 1 }
 0x189   :  { %1619 = vsyncpa [#allocation3 + $0x1], 1 }

</bundles_post_ra>
